<compile_context>
chip_gen: v7x
topology: tpu7x:2x2x1
jax: 0.10.0
libtpu: 0.0.40
codegen_flags: <defaults>
</compile_context>

<pallas_src>
import functools

import jax
import jax.numpy as jnp
from jax import lax
from jax.experimental import pallas as pl
from jax.experimental.pallas import tpu as pltpu


def _mkmmd_kernel(i_tbl_ref, j_tbl_ref, nig_ref, beta_ref,        # scalar prefetch (SMEM)
                  xi_ref, yi_ref, xjt_ref, yjt_ref,               # (T,F),(T,F),(F,T),(F,T)
                  sq_xi_ref, sq_yi_ref, sq_xj_ref, sq_yj_ref,     # (T,1),(T,1),(1,T),(1,T)
                  out_ref,                                        # (1, 8, 128) partial slab
                  *, tile, n_valid, mask_needed, compute_dtype):
    t = pl.program_id(0)
    ti = i_tbl_ref[t]
    tj = j_tbl_ref[t]
    is_diag = ti == tj

    xi = xi_ref[...]                                # native dtype for the MXU
    yi = yi_ref[...]
    xjt = xjt_ref[...]
    yjt = yjt_ref[...]

    sq_xi = sq_xi_ref[...]                          # (T, 1) f32 (hoisted norms)
    sq_yi = sq_yi_ref[...]
    sq_xj = sq_xj_ref[...]                          # (1, T) f32
    sq_yj = sq_yj_ref[...]

    # MXU-native (M,K) x (K,N) Gram tiles, f32 accumulation.
    g_xx = jnp.dot(xi, xjt, preferred_element_type=jnp.float32)
    g_yy = jnp.dot(yi, yjt, preferred_element_type=jnp.float32)
    g_xy = jnp.dot(xi, yjt, preferred_element_type=jnp.float32)
    g_yx = jnp.dot(yi, xjt, preferred_element_type=jnp.float32)   # only exp'd off-diag

    d_xx = jnp.maximum(sq_xi + sq_xj - 2.0 * g_xx, 0.0)           # (T, T) f32
    d_yy = jnp.maximum(sq_yi + sq_yj - 2.0 * g_yy, 0.0)
    d_xy = jnp.maximum(sq_xi + sq_yj - 2.0 * g_xy, 0.0)
    d_yx = jnp.maximum(sq_yi + sq_xj - 2.0 * g_yx, 0.0)

    # Mask for zero-padded rows/cols (exp(0)=1 would otherwise leak into the mean).
    if mask_needed:
        row = ti * tile + lax.broadcasted_iota(jnp.int32, (tile, 1), 0)
        col = tj * tile + lax.broadcasted_iota(jnp.int32, (1, tile), 1)
        mask = ((row < n_valid) & (col < n_valid)).astype(jnp.float32)
    else:
        mask = None

    cdt = compute_dtype
    d_xx_c = d_xx.astype(cdt)
    d_yy_c = d_yy.astype(cdt)
    d_xy_c = d_xy.astype(cdt)
    d_yx_c = d_yx.astype(cdt)

    num_kernels = nig_ref.shape[0]

    # S = sum_k beta_k * (e_xx + e_yy),  C = sum_k beta_k * e_xy   (f32 accumulation)
    s_acc = jnp.zeros(d_xx.shape, jnp.float32)
    c_acc = jnp.zeros(d_xx.shape, jnp.float32)
    for k in range(num_kernels):
        nig_k = nig_ref[k].astype(cdt)              # -1/gamma_k  (SMEM scalar)
        beta_k = beta_ref[k].astype(cdt)            # beta_k      (SMEM scalar)
        e_xx = jnp.exp(d_xx_c * nig_k)
        e_yy = jnp.exp(d_yy_c * nig_k)
        e_xy = jnp.exp(d_xy_c * nig_k)
        s_acc = s_acc + (beta_k * (e_xx + e_yy)).astype(jnp.float32)
        c_acc = c_acc + (beta_k * e_xy).astype(jnp.float32)

    if mask is not None:
        s_acc = s_acc * mask
        c_acc = c_acc * mask

    s_sum = jnp.sum(s_acc)
    c_sum = jnp.sum(c_acc)

    @pl.when(is_diag)
    def _diag():
        # sum(e_yx) == sum(e_xy) on a diagonal tile -> fold as a factor of 2.
        out_ref[...] = jnp.full(out_ref.shape, s_sum - 2.0 * c_sum, jnp.float32)

    @pl.when(jnp.logical_not(is_diag))
    def _off_diag():
        # The mirrored (j, i) tile contributes the same sums -> weight by 2,
        # but the yx plane must be computed explicitly here.
        d_acc = jnp.zeros(d_xx.shape, jnp.float32)
        for k in range(num_kernels):
            nig_k = nig_ref[k].astype(cdt)
            beta_k = beta_ref[k].astype(cdt)
            d_acc = d_acc + (beta_k * jnp.exp(d_yx_c * nig_k)).astype(jnp.float32)
        if mask is not None:
            d_acc = d_acc * mask
        d_sum = jnp.sum(d_acc)
        out_ref[...] = jnp.full(out_ref.shape,
                                2.0 * (s_sum - c_sum - d_sum), jnp.float32)


def _round_up(x: int, m: int) -> int:
    return (x + m - 1) // m * m


def _triangle_tables(num_i: int):
    """Linearized upper-triangle tile list, interleaved for megacore balance."""
    off = [(i, j) for i in range(num_i) for j in range(i + 1, num_i)]
    diag = [(i, i) for i in range(num_i)]
    ordered = off + diag                         # heavy (4-plane) tiles first
    ordered = ordered[0::2] + ordered[1::2]      # even heavy/light mix per half
    i_tbl = jnp.asarray([p[0] for p in ordered], jnp.int32)
    j_tbl = jnp.asarray([p[1] for p in ordered], jnp.int32)
    return i_tbl, j_tbl, len(ordered), len(off), len(diag)


def mkmmd_loss(x_s, x_t, gammas, betas, *, normalize_features: bool = False,
               max_tile: int = 256, use_bf16_exp: bool = False):
    """Pallas MK-MMD forward. x_s, x_t: (N, F). gammas, betas: (K,) or (K, 1)."""
    assert x_s.ndim == 2 and x_s.shape == x_t.shape
    n, f = x_s.shape

    if normalize_features:
        # TODO(synk): matches torch (no epsilon); an all-zero feature row yields NaN.
        x_s = x_s / jnp.linalg.norm(x_s, axis=1, keepdims=True)
        x_t = x_t / jnp.linalg.norm(x_t, axis=1, keepdims=True)

    gammas = jnp.asarray(gammas, jnp.float32).reshape(-1)
    betas = jnp.asarray(betas, jnp.float32).reshape(-1)
    neg_inv_g = -1.0 / gammas
    num_k = int(gammas.shape[0])

    # ---- square tile (triangular grid needs square tiles) + 128-aligned padding ----
    if n <= max_tile:
        tile = n                                   # single full-array tile, no padding
    else:
        tile = (max_tile // 128) * 128             # lane-aligned tile for big N
        if tile == 0:
            tile = _round_up(max_tile, 8)
    n_pad = _round_up(n, tile)
    mask_needed = n_pad > n

    if mask_needed:
        pad = n_pad - n
        x_s = jnp.pad(x_s, ((0, pad), (0, 0)))
        x_t = jnp.pad(x_t, ((0, pad), (0, 0)))

    num_i = n_pad // tile
    i_tbl, j_tbl, num_tiles, num_off, num_diag = _triangle_tables(num_i)

    # Hoisted squared row norms (f32), laid out for the i (column) / j (row) sides.
    xs_f = x_s.astype(jnp.float32)
    xt_f = x_t.astype(jnp.float32)
    sq_x = jnp.sum(xs_f * xs_f, axis=1, keepdims=True)            # (n_pad, 1)
    sq_y = jnp.sum(xt_f * xt_f, axis=1, keepdims=True)
    sq_x_row = sq_x.reshape(1, n_pad)                             # (1, n_pad)
    sq_y_row = sq_y.reshape(1, n_pad)

    # Pre-transposed j-side operands: MXU-native (M,K) x (K,N) feeds.
    xs_t = jnp.transpose(x_s)                                     # (F, n_pad)
    xt_t = jnp.transpose(x_t)

    itemsize = jnp.dtype(x_s.dtype).itemsize
    compute_dtype = jnp.bfloat16 if use_bf16_exp else jnp.float32

    # Rough per-step VMEM estimate: ~10 f32 (T,T) planes/accumulators (+bf16 copies),
    # double-buffered input row/col tiles, small norm vectors and the output slab.
    plane_bytes = 10 * tile * tile * 4
    if use_bf16_exp:
        plane_bytes += 4 * tile * tile * 2
    input_bytes = 2 * (2 * tile * f + 2 * f * tile) * itemsize
    est = plane_bytes + input_bytes + 2 * 4 * tile * 4 + 2 * 8 * 128 * 4
    try:
        vmem_cap = int(pltpu.get_tpu_info().vmem_capacity_bytes)
    except Exception:
        vmem_cap = 64 * 2 ** 20
    vmem_cap = max(vmem_cap, 48 * 2 ** 20)
    vmem_limit = int(min(max(2 * est, 32 * 2 ** 20), int(0.7 * vmem_cap)))
    # TODO(synk): chunk the feature axis (nested reduction) when tile*F*itemsize
    # alone approaches the per-core VMEM budget (very large F on v7x).

    planes = 4 * num_off + 3 * num_diag
    cost = pl.CostEstimate(
        flops=int(planes * 2 * tile * tile * f
                  + planes * (4 * num_k + 6) * tile * tile),
        transcendentals=int(planes * num_k * tile * tile),
        bytes_accessed=int(num_tiles * 4 * tile * f * itemsize
                           + num_tiles * (4 * tile + 8 * 128) * 4),
    )

    kernel = functools.partial(_mkmmd_kernel, tile=tile, n_valid=n,
                               mask_needed=mask_needed, compute_dtype=compute_dtype)

    grid_spec = pltpu.PrefetchScalarGridSpec(
        num_scalar_prefetch=4,                    # i_tbl, j_tbl, -1/gamma, beta -> SMEM
        grid=(num_tiles,),
        in_specs=[
            pl.BlockSpec((tile, f), lambda t, it, jt, *_: (it[t], 0)),   # x_s rows (i)
            pl.BlockSpec((tile, f), lambda t, it, jt, *_: (it[t], 0)),   # x_t rows (i)
            pl.BlockSpec((f, tile), lambda t, it, jt, *_: (0, jt[t])),   # x_s^T cols (j)
            pl.BlockSpec((f, tile), lambda t, it, jt, *_: (0, jt[t])),   # x_t^T cols (j)
            pl.BlockSpec((tile, 1), lambda t, it, jt, *_: (it[t], 0)),   # ||x||^2, i side
            pl.BlockSpec((tile, 1), lambda t, it, jt, *_: (it[t], 0)),   # ||y||^2, i side
            pl.BlockSpec((1, tile), lambda t, it, jt, *_: (0, jt[t])),   # ||x||^2, j side
            pl.BlockSpec((1, tile), lambda t, it, jt, *_: (0, jt[t])),   # ||y||^2, j side
        ],
        out_specs=pl.BlockSpec((1, 8, 128), lambda t, *_: (t, 0, 0)),
    )

    partials = pl.pallas_call(
        kernel,
        out_shape=jax.ShapeDtypeStruct((num_tiles, 8, 128), jnp.float32),
        grid_spec=grid_spec,
        compiler_params=pltpu.CompilerParams(
            dimension_semantics=("parallel",),
            vmem_limit_bytes=vmem_limit),
        cost_estimate=cost,
    )(i_tbl, j_tbl, neg_inv_g, betas, x_s, x_t, xs_t, xt_t,
      sq_x, sq_y, sq_x_row, sq_y_row)

    return jnp.sum(partials[:, 0, 0]) / jnp.float32(n * n)


def make_default_gammas():
    # torch.pow(2.0, torch.arange(-3.5, 1.25, 0.25)) -> 19 kernels
    powers = jnp.arange(-3.5, 1.25, 0.25, dtype=jnp.float32)
    return jnp.power(jnp.float32(2.0), powers)


def make_default_betas(key, kernel_num):
    # deterministic stand-in for torch.rand((K,1)) normalized to sum 1
    rand = jax.random.uniform(key, (kernel_num,), dtype=jnp.float32)
    return rand / jnp.sum(rand)


def mkmmd_reference(x, y, gammas, betas):
    # pure-JAX reference mirroring the torch module (all four distance planes)
    x = x.astype(jnp.float32)
    y = y.astype(jnp.float32)
    sq_x = jnp.sum(x * x, axis=1, keepdims=True)
    sq_y = jnp.sum(y * y, axis=1, keepdims=True)
    d_xx = jnp.maximum(sq_x + sq_x.T - 2.0 * x @ x.T, 0.0)
    d_yy = jnp.maximum(sq_y + sq_y.T - 2.0 * y @ y.T, 0.0)
    d_xy = jnp.maximum(sq_x + sq_y.T - 2.0 * x @ y.T, 0.0)
    d_yx = jnp.maximum(sq_y + sq_x.T - 2.0 * y @ x.T, 0.0)
    d = jnp.stack([d_xx, d_yy, d_xy, d_yx])                       # (4, N, N)
    h = jnp.exp(-d[None] / gammas[:, None, None, None])           # (K, 4, N, N)
    h_u = h[:, 0] + h[:, 1] - h[:, 2] - h[:, 3]                   # (K, N, N)
    hat_d = jnp.mean(h_u, axis=(1, 2))                            # (K,)
    return jnp.dot(betas, hat_d)


if __name__ == "__main__":
    key = jax.random.PRNGKey(0)
    k_beta, k_xs, k_xt = jax.random.split(key, 3)

    gammas = make_default_gammas()                        # (19,)
    betas = make_default_betas(k_beta, gammas.shape[0])   # (19,), sums to 1

    # 1) primary small case (single full-array tile, diagonal-only path)
    N, F = 8, 32
    x_s = jax.random.normal(k_xs, (N, F), dtype=jnp.float32)
    x_t = jax.random.normal(k_xt, (N, F), dtype=jnp.float32) + 0.5
    loss = mkmmd_loss(x_s, x_t, gammas, betas)
    jax.block_until_ready(loss)
    ref = mkmmd_reference(x_s, x_t, gammas, betas)
    assert jnp.allclose(loss, ref, atol=1e-5, rtol=1e-4), (loss, ref)

    # 2) multi-tile case exercising the triangular grid (diag + off-diag tiles)
    N2, F2 = 256, 64
    x_s2 = jax.random.normal(jax.random.PRNGKey(1), (N2, F2), dtype=jnp.float32)
    x_t2 = jax.random.normal(jax.random.PRNGKey(2), (N2, F2), dtype=jnp.float32) + 0.25
    loss2 = mkmmd_loss(x_s2, x_t2, gammas, betas, max_tile=128)
    jax.block_until_ready(loss2)
    ref2 = mkmmd_reference(x_s2, x_t2, gammas, betas)
    assert jnp.allclose(loss2, ref2, atol=1e-4, rtol=1e-3), (loss2, ref2)

    # 3) ragged N exercising the pad + explicit-mask path
    N3, F3 = 200, 64
    x_s3 = jax.random.normal(jax.random.PRNGKey(3), (N3, F3), dtype=jnp.float32)
    x_t3 = jax.random.normal(jax.random.PRNGKey(4), (N3, F3), dtype=jnp.float32) + 0.25
    loss3 = mkmmd_loss(x_s3, x_t3, gammas, betas, max_tile=128)
    jax.block_until_ready(loss3)
    ref3 = mkmmd_reference(x_s3, x_t3, gammas, betas)
    assert jnp.allclose(loss3, ref3, atol=1e-4, rtol=1e-3), (loss3, ref3)

    # 4) optional bf16-exp path (v6e/v7x speedup flag), looser tolerance
    loss_bf16 = mkmmd_loss(x_s, x_t, gammas, betas, use_bf16_exp=True)
    jax.block_until_ready(loss_bf16)
    assert jnp.allclose(loss_bf16, ref, atol=1e-2, rtol=2e-2), (loss_bf16, ref)

    print("KERNEL_OK")
</pallas_src>

<mosaic_0001>
module attributes {stable_mosaic.version = 11 : i64} {
  func.func @_mkmmd_kernel(%arg0: i32, %arg1: memref<1xi32, #tpu.memory_space<smem>>, %arg2: memref<1xi32, #tpu.memory_space<smem>>, %arg3: memref<19xf32, #tpu.memory_space<smem>>, %arg4: memref<19xf32, #tpu.memory_space<smem>>, %arg5: memref<8x32xf32, #tpu.memory_space<vmem>>, %arg6: memref<8x32xf32, #tpu.memory_space<vmem>>, %arg7: memref<32x8xf32, #tpu.memory_space<vmem>>, %arg8: memref<32x8xf32, #tpu.memory_space<vmem>>, %arg9: memref<8x1xf32, #tpu.memory_space<vmem>>, %arg10: memref<8x1xf32, #tpu.memory_space<vmem>>, %arg11: memref<1x8xf32, #tpu.memory_space<vmem>>, %arg12: memref<1x8xf32, #tpu.memory_space<vmem>>, %arg13: memref<1x8x128xf32, #tpu.memory_space<vmem>>) attributes {dimension_semantics = [#tpu.dimension_semantics<parallel>], iteration_bounds = array<i64: 1>, scalar_prefetch = 4 : i64, scratch_operands = 0 : i64, tpu.core_type = #tpu.core_type<tc>, window_params = [{transform_indices = @transform_0, window_bounds = array<i64: 8, 32>}, {transform_indices = @transform_1, window_bounds = array<i64: 8, 32>}, {transform_indices = @transform_2, window_bounds = array<i64: 32, 8>}, {transform_indices = @transform_3, window_bounds = array<i64: 32, 8>}, {transform_indices = @transform_4, window_bounds = array<i64: 8, 1>}, {transform_indices = @transform_5, window_bounds = array<i64: 8, 1>}, {transform_indices = @transform_6, window_bounds = array<i64: 1, 8>}, {transform_indices = @transform_7, window_bounds = array<i64: 1, 8>}, {transform_indices = @transform_8, window_bounds = array<i64: 1, 8, 128>}]} {
    %0 = arith.index_cast %arg0 : i32 to index
    %1 = memref.load %arg1[%0] : memref<1xi32, #tpu.memory_space<smem>>
    %2 = arith.index_cast %arg0 : i32 to index
    %3 = memref.load %arg2[%2] : memref<1xi32, #tpu.memory_space<smem>>
    %4 = arith.cmpi eq, %1, %3 : i32
    %c0 = arith.constant 0 : index
    %c0_0 = arith.constant 0 : index
    %5 = vector.load %arg5[%c0, %c0_0] : memref<8x32xf32, #tpu.memory_space<vmem>>, vector<8x32xf32>
    %c0_1 = arith.constant 0 : index
    %c0_2 = arith.constant 0 : index
    %6 = vector.load %arg6[%c0_1, %c0_2] : memref<8x32xf32, #tpu.memory_space<vmem>>, vector<8x32xf32>
    %c0_3 = arith.constant 0 : index
    %c0_4 = arith.constant 0 : index
    %7 = vector.load %arg7[%c0_3, %c0_4] : memref<32x8xf32, #tpu.memory_space<vmem>>, vector<32x8xf32>
    %c0_5 = arith.constant 0 : index
    %c0_6 = arith.constant 0 : index
    %8 = vector.load %arg8[%c0_5, %c0_6] : memref<32x8xf32, #tpu.memory_space<vmem>>, vector<32x8xf32>
    %c0_7 = arith.constant 0 : index
    %c0_8 = arith.constant 0 : index
    %9 = vector.load %arg9[%c0_7, %c0_8] : memref<8x1xf32, #tpu.memory_space<vmem>>, vector<8x1xf32>
    %c0_9 = arith.constant 0 : index
    %c0_10 = arith.constant 0 : index
    %10 = vector.load %arg10[%c0_9, %c0_10] : memref<8x1xf32, #tpu.memory_space<vmem>>, vector<8x1xf32>
    %c0_11 = arith.constant 0 : index
    %c0_12 = arith.constant 0 : index
    %11 = vector.load %arg11[%c0_11, %c0_12] : memref<1x8xf32, #tpu.memory_space<vmem>>, vector<1x8xf32>
    %c0_13 = arith.constant 0 : index
    %c0_14 = arith.constant 0 : index
    %12 = vector.load %arg12[%c0_13, %c0_14] : memref<1x8xf32, #tpu.memory_space<vmem>>, vector<1x8xf32>
    %cst = arith.constant dense<0.000000e+00> : vector<8x8xf32>
    %13 = tpu.matmul %5, %7, %cst {dimension_numbers = #tpu.dot_dimension_numbers<[1], [0], [0], [1], [0, 0, 1, 1], [], []>} : vector<8x32xf32>, vector<32x8xf32>, vector<8x8xf32> -> vector<8x8xf32>
    %cst_15 = arith.constant dense<0.000000e+00> : vector<8x8xf32>
    %14 = tpu.matmul %6, %8, %cst_15 {dimension_numbers = #tpu.dot_dimension_numbers<[1], [0], [0], [1], [0, 0, 1, 1], [], []>} : vector<8x32xf32>, vector<32x8xf32>, vector<8x8xf32> -> vector<8x8xf32>
    %cst_16 = arith.constant dense<0.000000e+00> : vector<8x8xf32>
    %15 = tpu.matmul %5, %8, %cst_16 {dimension_numbers = #tpu.dot_dimension_numbers<[1], [0], [0], [1], [0, 0, 1, 1], [], []>} : vector<8x32xf32>, vector<32x8xf32>, vector<8x8xf32> -> vector<8x8xf32>
    %cst_17 = arith.constant dense<0.000000e+00> : vector<8x8xf32>
    %16 = tpu.matmul %6, %7, %cst_17 {dimension_numbers = #tpu.dot_dimension_numbers<[1], [0], [0], [1], [0, 0, 1, 1], [], []>} : vector<8x32xf32>, vector<32x8xf32>, vector<8x8xf32> -> vector<8x8xf32>
    %17 = vector.broadcast %9 : vector<8x1xf32> to vector<8x8xf32>
    %18 = vector.broadcast %11 : vector<1x8xf32> to vector<8x8xf32>
    %19 = arith.addf %17, %18 : vector<8x8xf32>
    %cst_18 = arith.constant 2.000000e+00 : f32
    %20 = vector.broadcast %cst_18 : f32 to vector<8x8xf32>
    %21 = arith.mulf %20, %13 : vector<8x8xf32>
    %22 = arith.subf %19, %21 : vector<8x8xf32>
    %cst_19 = arith.constant 0.000000e+00 : f32
    %23 = vector.broadcast %cst_19 : f32 to vector<8x8xf32>
    %24 = arith.maximumf %22, %23 : vector<8x8xf32>
    %25 = vector.broadcast %10 : vector<8x1xf32> to vector<8x8xf32>
    %26 = vector.broadcast %12 : vector<1x8xf32> to vector<8x8xf32>
    %27 = arith.addf %25, %26 : vector<8x8xf32>
    %cst_20 = arith.constant 2.000000e+00 : f32
    %28 = vector.broadcast %cst_20 : f32 to vector<8x8xf32>
    %29 = arith.mulf %28, %14 : vector<8x8xf32>
    %30 = arith.subf %27, %29 : vector<8x8xf32>
    %cst_21 = arith.constant 0.000000e+00 : f32
    %31 = vector.broadcast %cst_21 : f32 to vector<8x8xf32>
    %32 = arith.maximumf %30, %31 : vector<8x8xf32>
    %33 = vector.broadcast %9 : vector<8x1xf32> to vector<8x8xf32>
    %34 = vector.broadcast %12 : vector<1x8xf32> to vector<8x8xf32>
    %35 = arith.addf %33, %34 : vector<8x8xf32>
    %cst_22 = arith.constant 2.000000e+00 : f32
    %36 = vector.broadcast %cst_22 : f32 to vector<8x8xf32>
    %37 = arith.mulf %36, %15 : vector<8x8xf32>
    %38 = arith.subf %35, %37 : vector<8x8xf32>
    %cst_23 = arith.constant 0.000000e+00 : f32
    %39 = vector.broadcast %cst_23 : f32 to vector<8x8xf32>
    %40 = arith.maximumf %38, %39 : vector<8x8xf32>
    %41 = vector.broadcast %10 : vector<8x1xf32> to vector<8x8xf32>
    %42 = vector.broadcast %11 : vector<1x8xf32> to vector<8x8xf32>
    %43 = arith.addf %41, %42 : vector<8x8xf32>
    %cst_24 = arith.constant 2.000000e+00 : f32
    %44 = vector.broadcast %cst_24 : f32 to vector<8x8xf32>
    %45 = arith.mulf %44, %16 : vector<8x8xf32>
    %46 = arith.subf %43, %45 : vector<8x8xf32>
    %cst_25 = arith.constant 0.000000e+00 : f32
    %47 = vector.broadcast %cst_25 : f32 to vector<8x8xf32>
    %48 = arith.maximumf %46, %47 : vector<8x8xf32>
    %cst_26 = arith.constant 0.000000e+00 : f32
    %49 = vector.broadcast %cst_26 : f32 to vector<8x8xf32>
    %cst_27 = arith.constant 0.000000e+00 : f32
    %50 = vector.broadcast %cst_27 : f32 to vector<8x8xf32>
    %c0_28 = arith.constant 0 : index
    %51 = memref.load %arg3[%c0_28] : memref<19xf32, #tpu.memory_space<smem>>
    %c0_29 = arith.constant 0 : index
    %52 = memref.load %arg4[%c0_29] : memref<19xf32, #tpu.memory_space<smem>>
    %53 = vector.broadcast %51 : f32 to vector<8x8xf32>
    %54 = arith.mulf %24, %53 : vector<8x8xf32>
    %55 = math.exp %54 : vector<8x8xf32>
    %56 = vector.broadcast %51 : f32 to vector<8x8xf32>
    %57 = arith.mulf %32, %56 : vector<8x8xf32>
    %58 = math.exp %57 : vector<8x8xf32>
    %59 = vector.broadcast %51 : f32 to vector<8x8xf32>
    %60 = arith.mulf %40, %59 : vector<8x8xf32>
    %61 = math.exp %60 : vector<8x8xf32>
    %62 = arith.addf %55, %58 : vector<8x8xf32>
    %63 = vector.broadcast %52 : f32 to vector<8x8xf32>
    %64 = arith.mulf %63, %62 : vector<8x8xf32>
    %65 = arith.addf %49, %64 : vector<8x8xf32>
    %66 = vector.broadcast %52 : f32 to vector<8x8xf32>
    %67 = arith.mulf %66, %61 : vector<8x8xf32>
    %68 = arith.addf %50, %67 : vector<8x8xf32>
    %c1 = arith.constant 1 : index
    %69 = memref.load %arg3[%c1] : memref<19xf32, #tpu.memory_space<smem>>
    %c1_30 = arith.constant 1 : index
    %70 = memref.load %arg4[%c1_30] : memref<19xf32, #tpu.memory_space<smem>>
    %71 = vector.broadcast %69 : f32 to vector<8x8xf32>
    %72 = arith.mulf %24, %71 : vector<8x8xf32>
    %73 = math.exp %72 : vector<8x8xf32>
    %74 = vector.broadcast %69 : f32 to vector<8x8xf32>
    %75 = arith.mulf %32, %74 : vector<8x8xf32>
    %76 = math.exp %75 : vector<8x8xf32>
    %77 = vector.broadcast %69 : f32 to vector<8x8xf32>
    %78 = arith.mulf %40, %77 : vector<8x8xf32>
    %79 = math.exp %78 : vector<8x8xf32>
    %80 = arith.addf %73, %76 : vector<8x8xf32>
    %81 = vector.broadcast %70 : f32 to vector<8x8xf32>
    %82 = arith.mulf %81, %80 : vector<8x8xf32>
    %83 = arith.addf %65, %82 : vector<8x8xf32>
    %84 = vector.broadcast %70 : f32 to vector<8x8xf32>
    %85 = arith.mulf %84, %79 : vector<8x8xf32>
    %86 = arith.addf %68, %85 : vector<8x8xf32>
    %c2 = arith.constant 2 : index
    %87 = memref.load %arg3[%c2] : memref<19xf32, #tpu.memory_space<smem>>
    %c2_31 = arith.constant 2 : index
    %88 = memref.load %arg4[%c2_31] : memref<19xf32, #tpu.memory_space<smem>>
    %89 = vector.broadcast %87 : f32 to vector<8x8xf32>
    %90 = arith.mulf %24, %89 : vector<8x8xf32>
    %91 = math.exp %90 : vector<8x8xf32>
    %92 = vector.broadcast %87 : f32 to vector<8x8xf32>
    %93 = arith.mulf %32, %92 : vector<8x8xf32>
    %94 = math.exp %93 : vector<8x8xf32>
    %95 = vector.broadcast %87 : f32 to vector<8x8xf32>
    %96 = arith.mulf %40, %95 : vector<8x8xf32>
    %97 = math.exp %96 : vector<8x8xf32>
    %98 = arith.addf %91, %94 : vector<8x8xf32>
    %99 = vector.broadcast %88 : f32 to vector<8x8xf32>
    %100 = arith.mulf %99, %98 : vector<8x8xf32>
    %101 = arith.addf %83, %100 : vector<8x8xf32>
    %102 = vector.broadcast %88 : f32 to vector<8x8xf32>
    %103 = arith.mulf %102, %97 : vector<8x8xf32>
    %104 = arith.addf %86, %103 : vector<8x8xf32>
    %c3 = arith.constant 3 : index
    %105 = memref.load %arg3[%c3] : memref<19xf32, #tpu.memory_space<smem>>
    %c3_32 = arith.constant 3 : index
    %106 = memref.load %arg4[%c3_32] : memref<19xf32, #tpu.memory_space<smem>>
    %107 = vector.broadcast %105 : f32 to vector<8x8xf32>
    %108 = arith.mulf %24, %107 : vector<8x8xf32>
    %109 = math.exp %108 : vector<8x8xf32>
    %110 = vector.broadcast %105 : f32 to vector<8x8xf32>
    %111 = arith.mulf %32, %110 : vector<8x8xf32>
    %112 = math.exp %111 : vector<8x8xf32>
    %113 = vector.broadcast %105 : f32 to vector<8x8xf32>
    %114 = arith.mulf %40, %113 : vector<8x8xf32>
    %115 = math.exp %114 : vector<8x8xf32>
    %116 = arith.addf %109, %112 : vector<8x8xf32>
    %117 = vector.broadcast %106 : f32 to vector<8x8xf32>
    %118 = arith.mulf %117, %116 : vector<8x8xf32>
    %119 = arith.addf %101, %118 : vector<8x8xf32>
    %120 = vector.broadcast %106 : f32 to vector<8x8xf32>
    %121 = arith.mulf %120, %115 : vector<8x8xf32>
    %122 = arith.addf %104, %121 : vector<8x8xf32>
    %c4 = arith.constant 4 : index
    %123 = memref.load %arg3[%c4] : memref<19xf32, #tpu.memory_space<smem>>
    %c4_33 = arith.constant 4 : index
    %124 = memref.load %arg4[%c4_33] : memref<19xf32, #tpu.memory_space<smem>>
    %125 = vector.broadcast %123 : f32 to vector<8x8xf32>
    %126 = arith.mulf %24, %125 : vector<8x8xf32>
    %127 = math.exp %126 : vector<8x8xf32>
    %128 = vector.broadcast %123 : f32 to vector<8x8xf32>
    %129 = arith.mulf %32, %128 : vector<8x8xf32>
    %130 = math.exp %129 : vector<8x8xf32>
    %131 = vector.broadcast %123 : f32 to vector<8x8xf32>
    %132 = arith.mulf %40, %131 : vector<8x8xf32>
    %133 = math.exp %132 : vector<8x8xf32>
    %134 = arith.addf %127, %130 : vector<8x8xf32>
    %135 = vector.broadcast %124 : f32 to vector<8x8xf32>
    %136 = arith.mulf %135, %134 : vector<8x8xf32>
    %137 = arith.addf %119, %136 : vector<8x8xf32>
    %138 = vector.broadcast %124 : f32 to vector<8x8xf32>
    %139 = arith.mulf %138, %133 : vector<8x8xf32>
    %140 = arith.addf %122, %139 : vector<8x8xf32>
    %c5 = arith.constant 5 : index
    %141 = memref.load %arg3[%c5] : memref<19xf32, #tpu.memory_space<smem>>
    %c5_34 = arith.constant 5 : index
    %142 = memref.load %arg4[%c5_34] : memref<19xf32, #tpu.memory_space<smem>>
    %143 = vector.broadcast %141 : f32 to vector<8x8xf32>
    %144 = arith.mulf %24, %143 : vector<8x8xf32>
    %145 = math.exp %144 : vector<8x8xf32>
    %146 = vector.broadcast %141 : f32 to vector<8x8xf32>
    %147 = arith.mulf %32, %146 : vector<8x8xf32>
    %148 = math.exp %147 : vector<8x8xf32>
    %149 = vector.broadcast %141 : f32 to vector<8x8xf32>
    %150 = arith.mulf %40, %149 : vector<8x8xf32>
    %151 = math.exp %150 : vector<8x8xf32>
    %152 = arith.addf %145, %148 : vector<8x8xf32>
    %153 = vector.broadcast %142 : f32 to vector<8x8xf32>
    %154 = arith.mulf %153, %152 : vector<8x8xf32>
    %155 = arith.addf %137, %154 : vector<8x8xf32>
    %156 = vector.broadcast %142 : f32 to vector<8x8xf32>
    %157 = arith.mulf %156, %151 : vector<8x8xf32>
    %158 = arith.addf %140, %157 : vector<8x8xf32>
    %c6 = arith.constant 6 : index
    %159 = memref.load %arg3[%c6] : memref<19xf32, #tpu.memory_space<smem>>
    %c6_35 = arith.constant 6 : index
    %160 = memref.load %arg4[%c6_35] : memref<19xf32, #tpu.memory_space<smem>>
    %161 = vector.broadcast %159 : f32 to vector<8x8xf32>
    %162 = arith.mulf %24, %161 : vector<8x8xf32>
    %163 = math.exp %162 : vector<8x8xf32>
    %164 = vector.broadcast %159 : f32 to vector<8x8xf32>
    %165 = arith.mulf %32, %164 : vector<8x8xf32>
    %166 = math.exp %165 : vector<8x8xf32>
    %167 = vector.broadcast %159 : f32 to vector<8x8xf32>
    %168 = arith.mulf %40, %167 : vector<8x8xf32>
    %169 = math.exp %168 : vector<8x8xf32>
    %170 = arith.addf %163, %166 : vector<8x8xf32>
    %171 = vector.broadcast %160 : f32 to vector<8x8xf32>
    %172 = arith.mulf %171, %170 : vector<8x8xf32>
    %173 = arith.addf %155, %172 : vector<8x8xf32>
    %174 = vector.broadcast %160 : f32 to vector<8x8xf32>
    %175 = arith.mulf %174, %169 : vector<8x8xf32>
    %176 = arith.addf %158, %175 : vector<8x8xf32>
    %c7 = arith.constant 7 : index
    %177 = memref.load %arg3[%c7] : memref<19xf32, #tpu.memory_space<smem>>
    %c7_36 = arith.constant 7 : index
    %178 = memref.load %arg4[%c7_36] : memref<19xf32, #tpu.memory_space<smem>>
    %179 = vector.broadcast %177 : f32 to vector<8x8xf32>
    %180 = arith.mulf %24, %179 : vector<8x8xf32>
    %181 = math.exp %180 : vector<8x8xf32>
    %182 = vector.broadcast %177 : f32 to vector<8x8xf32>
    %183 = arith.mulf %32, %182 : vector<8x8xf32>
    %184 = math.exp %183 : vector<8x8xf32>
    %185 = vector.broadcast %177 : f32 to vector<8x8xf32>
    %186 = arith.mulf %40, %185 : vector<8x8xf32>
    %187 = math.exp %186 : vector<8x8xf32>
    %188 = arith.addf %181, %184 : vector<8x8xf32>
    %189 = vector.broadcast %178 : f32 to vector<8x8xf32>
    %190 = arith.mulf %189, %188 : vector<8x8xf32>
    %191 = arith.addf %173, %190 : vector<8x8xf32>
    %192 = vector.broadcast %178 : f32 to vector<8x8xf32>
    %193 = arith.mulf %192, %187 : vector<8x8xf32>
    %194 = arith.addf %176, %193 : vector<8x8xf32>
    %c8 = arith.constant 8 : index
    %195 = memref.load %arg3[%c8] : memref<19xf32, #tpu.memory_space<smem>>
    %c8_37 = arith.constant 8 : index
    %196 = memref.load %arg4[%c8_37] : memref<19xf32, #tpu.memory_space<smem>>
    %197 = vector.broadcast %195 : f32 to vector<8x8xf32>
    %198 = arith.mulf %24, %197 : vector<8x8xf32>
    %199 = math.exp %198 : vector<8x8xf32>
    %200 = vector.broadcast %195 : f32 to vector<8x8xf32>
    %201 = arith.mulf %32, %200 : vector<8x8xf32>
    %202 = math.exp %201 : vector<8x8xf32>
    %203 = vector.broadcast %195 : f32 to vector<8x8xf32>
    %204 = arith.mulf %40, %203 : vector<8x8xf32>
    %205 = math.exp %204 : vector<8x8xf32>
    %206 = arith.addf %199, %202 : vector<8x8xf32>
    %207 = vector.broadcast %196 : f32 to vector<8x8xf32>
    %208 = arith.mulf %207, %206 : vector<8x8xf32>
    %209 = arith.addf %191, %208 : vector<8x8xf32>
    %210 = vector.broadcast %196 : f32 to vector<8x8xf32>
    %211 = arith.mulf %210, %205 : vector<8x8xf32>
    %212 = arith.addf %194, %211 : vector<8x8xf32>
    %c9 = arith.constant 9 : index
    %213 = memref.load %arg3[%c9] : memref<19xf32, #tpu.memory_space<smem>>
    %c9_38 = arith.constant 9 : index
    %214 = memref.load %arg4[%c9_38] : memref<19xf32, #tpu.memory_space<smem>>
    %215 = vector.broadcast %213 : f32 to vector<8x8xf32>
    %216 = arith.mulf %24, %215 : vector<8x8xf32>
    %217 = math.exp %216 : vector<8x8xf32>
    %218 = vector.broadcast %213 : f32 to vector<8x8xf32>
    %219 = arith.mulf %32, %218 : vector<8x8xf32>
    %220 = math.exp %219 : vector<8x8xf32>
    %221 = vector.broadcast %213 : f32 to vector<8x8xf32>
    %222 = arith.mulf %40, %221 : vector<8x8xf32>
    %223 = math.exp %222 : vector<8x8xf32>
    %224 = arith.addf %217, %220 : vector<8x8xf32>
    %225 = vector.broadcast %214 : f32 to vector<8x8xf32>
    %226 = arith.mulf %225, %224 : vector<8x8xf32>
    %227 = arith.addf %209, %226 : vector<8x8xf32>
    %228 = vector.broadcast %214 : f32 to vector<8x8xf32>
    %229 = arith.mulf %228, %223 : vector<8x8xf32>
    %230 = arith.addf %212, %229 : vector<8x8xf32>
    %c10 = arith.constant 10 : index
    %231 = memref.load %arg3[%c10] : memref<19xf32, #tpu.memory_space<smem>>
    %c10_39 = arith.constant 10 : index
    %232 = memref.load %arg4[%c10_39] : memref<19xf32, #tpu.memory_space<smem>>
    %233 = vector.broadcast %231 : f32 to vector<8x8xf32>
    %234 = arith.mulf %24, %233 : vector<8x8xf32>
    %235 = math.exp %234 : vector<8x8xf32>
    %236 = vector.broadcast %231 : f32 to vector<8x8xf32>
    %237 = arith.mulf %32, %236 : vector<8x8xf32>
    %238 = math.exp %237 : vector<8x8xf32>
    %239 = vector.broadcast %231 : f32 to vector<8x8xf32>
    %240 = arith.mulf %40, %239 : vector<8x8xf32>
    %241 = math.exp %240 : vector<8x8xf32>
    %242 = arith.addf %235, %238 : vector<8x8xf32>
    %243 = vector.broadcast %232 : f32 to vector<8x8xf32>
    %244 = arith.mulf %243, %242 : vector<8x8xf32>
    %245 = arith.addf %227, %244 : vector<8x8xf32>
    %246 = vector.broadcast %232 : f32 to vector<8x8xf32>
    %247 = arith.mulf %246, %241 : vector<8x8xf32>
    %248 = arith.addf %230, %247 : vector<8x8xf32>
    %c11 = arith.constant 11 : index
    %249 = memref.load %arg3[%c11] : memref<19xf32, #tpu.memory_space<smem>>
    %c11_40 = arith.constant 11 : index
    %250 = memref.load %arg4[%c11_40] : memref<19xf32, #tpu.memory_space<smem>>
    %251 = vector.broadcast %249 : f32 to vector<8x8xf32>
    %252 = arith.mulf %24, %251 : vector<8x8xf32>
    %253 = math.exp %252 : vector<8x8xf32>
    %254 = vector.broadcast %249 : f32 to vector<8x8xf32>
    %255 = arith.mulf %32, %254 : vector<8x8xf32>
    %256 = math.exp %255 : vector<8x8xf32>
    %257 = vector.broadcast %249 : f32 to vector<8x8xf32>
    %258 = arith.mulf %40, %257 : vector<8x8xf32>
    %259 = math.exp %258 : vector<8x8xf32>
    %260 = arith.addf %253, %256 : vector<8x8xf32>
    %261 = vector.broadcast %250 : f32 to vector<8x8xf32>
    %262 = arith.mulf %261, %260 : vector<8x8xf32>
    %263 = arith.addf %245, %262 : vector<8x8xf32>
    %264 = vector.broadcast %250 : f32 to vector<8x8xf32>
    %265 = arith.mulf %264, %259 : vector<8x8xf32>
    %266 = arith.addf %248, %265 : vector<8x8xf32>
    %c12 = arith.constant 12 : index
    %267 = memref.load %arg3[%c12] : memref<19xf32, #tpu.memory_space<smem>>
    %c12_41 = arith.constant 12 : index
    %268 = memref.load %arg4[%c12_41] : memref<19xf32, #tpu.memory_space<smem>>
    %269 = vector.broadcast %267 : f32 to vector<8x8xf32>
    %270 = arith.mulf %24, %269 : vector<8x8xf32>
    %271 = math.exp %270 : vector<8x8xf32>
    %272 = vector.broadcast %267 : f32 to vector<8x8xf32>
    %273 = arith.mulf %32, %272 : vector<8x8xf32>
    %274 = math.exp %273 : vector<8x8xf32>
    %275 = vector.broadcast %267 : f32 to vector<8x8xf32>
    %276 = arith.mulf %40, %275 : vector<8x8xf32>
    %277 = math.exp %276 : vector<8x8xf32>
    %278 = arith.addf %271, %274 : vector<8x8xf32>
    %279 = vector.broadcast %268 : f32 to vector<8x8xf32>
    %280 = arith.mulf %279, %278 : vector<8x8xf32>
    %281 = arith.addf %263, %280 : vector<8x8xf32>
    %282 = vector.broadcast %268 : f32 to vector<8x8xf32>
    %283 = arith.mulf %282, %277 : vector<8x8xf32>
    %284 = arith.addf %266, %283 : vector<8x8xf32>
    %c13 = arith.constant 13 : index
    %285 = memref.load %arg3[%c13] : memref<19xf32, #tpu.memory_space<smem>>
    %c13_42 = arith.constant 13 : index
    %286 = memref.load %arg4[%c13_42] : memref<19xf32, #tpu.memory_space<smem>>
    %287 = vector.broadcast %285 : f32 to vector<8x8xf32>
    %288 = arith.mulf %24, %287 : vector<8x8xf32>
    %289 = math.exp %288 : vector<8x8xf32>
    %290 = vector.broadcast %285 : f32 to vector<8x8xf32>
    %291 = arith.mulf %32, %290 : vector<8x8xf32>
    %292 = math.exp %291 : vector<8x8xf32>
    %293 = vector.broadcast %285 : f32 to vector<8x8xf32>
    %294 = arith.mulf %40, %293 : vector<8x8xf32>
    %295 = math.exp %294 : vector<8x8xf32>
    %296 = arith.addf %289, %292 : vector<8x8xf32>
    %297 = vector.broadcast %286 : f32 to vector<8x8xf32>
    %298 = arith.mulf %297, %296 : vector<8x8xf32>
    %299 = arith.addf %281, %298 : vector<8x8xf32>
    %300 = vector.broadcast %286 : f32 to vector<8x8xf32>
    %301 = arith.mulf %300, %295 : vector<8x8xf32>
    %302 = arith.addf %284, %301 : vector<8x8xf32>
    %c14 = arith.constant 14 : index
    %303 = memref.load %arg3[%c14] : memref<19xf32, #tpu.memory_space<smem>>
    %c14_43 = arith.constant 14 : index
    %304 = memref.load %arg4[%c14_43] : memref<19xf32, #tpu.memory_space<smem>>
    %305 = vector.broadcast %303 : f32 to vector<8x8xf32>
    %306 = arith.mulf %24, %305 : vector<8x8xf32>
    %307 = math.exp %306 : vector<8x8xf32>
    %308 = vector.broadcast %303 : f32 to vector<8x8xf32>
    %309 = arith.mulf %32, %308 : vector<8x8xf32>
    %310 = math.exp %309 : vector<8x8xf32>
    %311 = vector.broadcast %303 : f32 to vector<8x8xf32>
    %312 = arith.mulf %40, %311 : vector<8x8xf32>
    %313 = math.exp %312 : vector<8x8xf32>
    %314 = arith.addf %307, %310 : vector<8x8xf32>
    %315 = vector.broadcast %304 : f32 to vector<8x8xf32>
    %316 = arith.mulf %315, %314 : vector<8x8xf32>
    %317 = arith.addf %299, %316 : vector<8x8xf32>
    %318 = vector.broadcast %304 : f32 to vector<8x8xf32>
    %319 = arith.mulf %318, %313 : vector<8x8xf32>
    %320 = arith.addf %302, %319 : vector<8x8xf32>
    %c15 = arith.constant 15 : index
    %321 = memref.load %arg3[%c15] : memref<19xf32, #tpu.memory_space<smem>>
    %c15_44 = arith.constant 15 : index
    %322 = memref.load %arg4[%c15_44] : memref<19xf32, #tpu.memory_space<smem>>
    %323 = vector.broadcast %321 : f32 to vector<8x8xf32>
    %324 = arith.mulf %24, %323 : vector<8x8xf32>
    %325 = math.exp %324 : vector<8x8xf32>
    %326 = vector.broadcast %321 : f32 to vector<8x8xf32>
    %327 = arith.mulf %32, %326 : vector<8x8xf32>
    %328 = math.exp %327 : vector<8x8xf32>
    %329 = vector.broadcast %321 : f32 to vector<8x8xf32>
    %330 = arith.mulf %40, %329 : vector<8x8xf32>
    %331 = math.exp %330 : vector<8x8xf32>
    %332 = arith.addf %325, %328 : vector<8x8xf32>
    %333 = vector.broadcast %322 : f32 to vector<8x8xf32>
    %334 = arith.mulf %333, %332 : vector<8x8xf32>
    %335 = arith.addf %317, %334 : vector<8x8xf32>
    %336 = vector.broadcast %322 : f32 to vector<8x8xf32>
    %337 = arith.mulf %336, %331 : vector<8x8xf32>
    %338 = arith.addf %320, %337 : vector<8x8xf32>
    %c16 = arith.constant 16 : index
    %339 = memref.load %arg3[%c16] : memref<19xf32, #tpu.memory_space<smem>>
    %c16_45 = arith.constant 16 : index
    %340 = memref.load %arg4[%c16_45] : memref<19xf32, #tpu.memory_space<smem>>
    %341 = vector.broadcast %339 : f32 to vector<8x8xf32>
    %342 = arith.mulf %24, %341 : vector<8x8xf32>
    %343 = math.exp %342 : vector<8x8xf32>
    %344 = vector.broadcast %339 : f32 to vector<8x8xf32>
    %345 = arith.mulf %32, %344 : vector<8x8xf32>
    %346 = math.exp %345 : vector<8x8xf32>
    %347 = vector.broadcast %339 : f32 to vector<8x8xf32>
    %348 = arith.mulf %40, %347 : vector<8x8xf32>
    %349 = math.exp %348 : vector<8x8xf32>
    %350 = arith.addf %343, %346 : vector<8x8xf32>
    %351 = vector.broadcast %340 : f32 to vector<8x8xf32>
    %352 = arith.mulf %351, %350 : vector<8x8xf32>
    %353 = arith.addf %335, %352 : vector<8x8xf32>
    %354 = vector.broadcast %340 : f32 to vector<8x8xf32>
    %355 = arith.mulf %354, %349 : vector<8x8xf32>
    %356 = arith.addf %338, %355 : vector<8x8xf32>
    %c17 = arith.constant 17 : index
    %357 = memref.load %arg3[%c17] : memref<19xf32, #tpu.memory_space<smem>>
    %c17_46 = arith.constant 17 : index
    %358 = memref.load %arg4[%c17_46] : memref<19xf32, #tpu.memory_space<smem>>
    %359 = vector.broadcast %357 : f32 to vector<8x8xf32>
    %360 = arith.mulf %24, %359 : vector<8x8xf32>
    %361 = math.exp %360 : vector<8x8xf32>
    %362 = vector.broadcast %357 : f32 to vector<8x8xf32>
    %363 = arith.mulf %32, %362 : vector<8x8xf32>
    %364 = math.exp %363 : vector<8x8xf32>
    %365 = vector.broadcast %357 : f32 to vector<8x8xf32>
    %366 = arith.mulf %40, %365 : vector<8x8xf32>
    %367 = math.exp %366 : vector<8x8xf32>
    %368 = arith.addf %361, %364 : vector<8x8xf32>
    %369 = vector.broadcast %358 : f32 to vector<8x8xf32>
    %370 = arith.mulf %369, %368 : vector<8x8xf32>
    %371 = arith.addf %353, %370 : vector<8x8xf32>
    %372 = vector.broadcast %358 : f32 to vector<8x8xf32>
    %373 = arith.mulf %372, %367 : vector<8x8xf32>
    %374 = arith.addf %356, %373 : vector<8x8xf32>
    %c18 = arith.constant 18 : index
    %375 = memref.load %arg3[%c18] : memref<19xf32, #tpu.memory_space<smem>>
    %c18_47 = arith.constant 18 : index
    %376 = memref.load %arg4[%c18_47] : memref<19xf32, #tpu.memory_space<smem>>
    %377 = vector.broadcast %375 : f32 to vector<8x8xf32>
    %378 = arith.mulf %24, %377 : vector<8x8xf32>
    %379 = math.exp %378 : vector<8x8xf32>
    %380 = vector.broadcast %375 : f32 to vector<8x8xf32>
    %381 = arith.mulf %32, %380 : vector<8x8xf32>
    %382 = math.exp %381 : vector<8x8xf32>
    %383 = vector.broadcast %375 : f32 to vector<8x8xf32>
    %384 = arith.mulf %40, %383 : vector<8x8xf32>
    %385 = math.exp %384 : vector<8x8xf32>
    %386 = arith.addf %379, %382 : vector<8x8xf32>
    %387 = vector.broadcast %376 : f32 to vector<8x8xf32>
    %388 = arith.mulf %387, %386 : vector<8x8xf32>
    %389 = arith.addf %371, %388 : vector<8x8xf32>
    %390 = vector.broadcast %376 : f32 to vector<8x8xf32>
    %391 = arith.mulf %390, %385 : vector<8x8xf32>
    %392 = arith.addf %374, %391 : vector<8x8xf32>
    %393 = vector.shape_cast %389 : vector<8x8xf32> to vector<1x8x8xf32>
    %cst_48 = arith.constant dense<0.000000e+00> : vector<1xf32>
    %394 = vector.multi_reduction <add>, %393, %cst_48 [1, 2] : vector<1x8x8xf32> to vector<1xf32>
    %395 = vector.shape_cast %394 : vector<1xf32> to vector<1x1x1xf32>
    %396 = vector.extract %395[0, 0, 0] : f32 from vector<1x1x1xf32>
    %397 = vector.shape_cast %392 : vector<8x8xf32> to vector<1x8x8xf32>
    %cst_49 = arith.constant dense<0.000000e+00> : vector<1xf32>
    %398 = vector.multi_reduction <add>, %397, %cst_49 [1, 2] : vector<1x8x8xf32> to vector<1xf32>
    %399 = vector.shape_cast %398 : vector<1xf32> to vector<1x1x1xf32>
    %400 = vector.extract %399[0, 0, 0] : f32 from vector<1x1x1xf32>
    %401 = arith.extui %4 : i1 to i32
    %c0_i32 = arith.constant 0 : i32
    %402 = arith.cmpi ne, %401, %c0_i32 : i32
    scf.if %402 {
      %cst_51 = arith.constant 2.000000e+00 : f32
      %406 = arith.mulf %cst_51, %400 : f32
      %407 = arith.subf %396, %406 : f32
      %408 = vector.broadcast %407 : f32 to vector<1x8x128xf32>
      %c0_52 = arith.constant 0 : index
      %c0_53 = arith.constant 0 : index
      %c0_54 = arith.constant 0 : index
      %409 = vector.load %arg13[%c0_52, %c0_53, %c0_54] : memref<1x8x128xf32, #tpu.memory_space<vmem>>, vector<1x8x128xf32>
      tpu.vector_store %arg13[%c0_52, %c0_53, %c0_54], %408 {strides = array<i32>} : memref<1x8x128xf32, #tpu.memory_space<vmem>>, vector<1x8x128xf32>,
    } else {
    }
    %true = arith.constant true
    %403 = arith.xori %4, %true : i1
    %404 = arith.extui %403 : i1 to i32
    %c0_i32_50 = arith.constant 0 : i32
    %405 = arith.cmpi ne, %404, %c0_i32_50 : i32
    scf.if %405 {
      %cst_51 = arith.constant 0.000000e+00 : f32
      %406 = vector.broadcast %cst_51 : f32 to vector<8x8xf32>
      %c0_52 = arith.constant 0 : index
      %407 = memref.load %arg3[%c0_52] : memref<19xf32, #tpu.memory_space<smem>>
      %c0_53 = arith.constant 0 : index
      %408 = memref.load %arg4[%c0_53] : memref<19xf32, #tpu.memory_space<smem>>
      %409 = vector.broadcast %407 : f32 to vector<8x8xf32>
      %410 = arith.mulf %48, %409 : vector<8x8xf32>
      %411 = math.exp %410 : vector<8x8xf32>
      %412 = vector.broadcast %408 : f32 to vector<8x8xf32>
      %413 = arith.mulf %412, %411 : vector<8x8xf32>
      %414 = arith.addf %406, %413 : vector<8x8xf32>
      %c1_54 = arith.constant 1 : index
      %415 = memref.load %arg3[%c1_54] : memref<19xf32, #tpu.memory_space<smem>>
      %c1_55 = arith.constant 1 : index
      %416 = memref.load %arg4[%c1_55] : memref<19xf32, #tpu.memory_space<smem>>
      %417 = vector.broadcast %415 : f32 to vector<8x8xf32>
      %418 = arith.mulf %48, %417 : vector<8x8xf32>
      %419 = math.exp %418 : vector<8x8xf32>
      %420 = vector.broadcast %416 : f32 to vector<8x8xf32>
      %421 = arith.mulf %420, %419 : vector<8x8xf32>
      %422 = arith.addf %414, %421 : vector<8x8xf32>
      %c2_56 = arith.constant 2 : index
      %423 = memref.load %arg3[%c2_56] : memref<19xf32, #tpu.memory_space<smem>>
      %c2_57 = arith.constant 2 : index
      %424 = memref.load %arg4[%c2_57] : memref<19xf32, #tpu.memory_space<smem>>
      %425 = vector.broadcast %423 : f32 to vector<8x8xf32>
      %426 = arith.mulf %48, %425 : vector<8x8xf32>
      %427 = math.exp %426 : vector<8x8xf32>
      %428 = vector.broadcast %424 : f32 to vector<8x8xf32>
      %429 = arith.mulf %428, %427 : vector<8x8xf32>
      %430 = arith.addf %422, %429 : vector<8x8xf32>
      %c3_58 = arith.constant 3 : index
      %431 = memref.load %arg3[%c3_58] : memref<19xf32, #tpu.memory_space<smem>>
      %c3_59 = arith.constant 3 : index
      %432 = memref.load %arg4[%c3_59] : memref<19xf32, #tpu.memory_space<smem>>
      %433 = vector.broadcast %431 : f32 to vector<8x8xf32>
      %434 = arith.mulf %48, %433 : vector<8x8xf32>
      %435 = math.exp %434 : vector<8x8xf32>
      %436 = vector.broadcast %432 : f32 to vector<8x8xf32>
      %437 = arith.mulf %436, %435 : vector<8x8xf32>
      %438 = arith.addf %430, %437 : vector<8x8xf32>
      %c4_60 = arith.constant 4 : index
      %439 = memref.load %arg3[%c4_60] : memref<19xf32, #tpu.memory_space<smem>>
      %c4_61 = arith.constant 4 : index
      %440 = memref.load %arg4[%c4_61] : memref<19xf32, #tpu.memory_space<smem>>
      %441 = vector.broadcast %439 : f32 to vector<8x8xf32>
      %442 = arith.mulf %48, %441 : vector<8x8xf32>
      %443 = math.exp %442 : vector<8x8xf32>
      %444 = vector.broadcast %440 : f32 to vector<8x8xf32>
      %445 = arith.mulf %444, %443 : vector<8x8xf32>
      %446 = arith.addf %438, %445 : vector<8x8xf32>
      %c5_62 = arith.constant 5 : index
      %447 = memref.load %arg3[%c5_62] : memref<19xf32, #tpu.memory_space<smem>>
      %c5_63 = arith.constant 5 : index
      %448 = memref.load %arg4[%c5_63] : memref<19xf32, #tpu.memory_space<smem>>
      %449 = vector.broadcast %447 : f32 to vector<8x8xf32>
      %450 = arith.mulf %48, %449 : vector<8x8xf32>
      %451 = math.exp %450 : vector<8x8xf32>
      %452 = vector.broadcast %448 : f32 to vector<8x8xf32>
      %453 = arith.mulf %452, %451 : vector<8x8xf32>
      %454 = arith.addf %446, %453 : vector<8x8xf32>
      %c6_64 = arith.constant 6 : index
      %455 = memref.load %arg3[%c6_64] : memref<19xf32, #tpu.memory_space<smem>>
      %c6_65 = arith.constant 6 : index
      %456 = memref.load %arg4[%c6_65] : memref<19xf32, #tpu.memory_space<smem>>
      %457 = vector.broadcast %455 : f32 to vector<8x8xf32>
      %458 = arith.mulf %48, %457 : vector<8x8xf32>
      %459 = math.exp %458 : vector<8x8xf32>
      %460 = vector.broadcast %456 : f32 to vector<8x8xf32>
      %461 = arith.mulf %460, %459 : vector<8x8xf32>
      %462 = arith.addf %454, %461 : vector<8x8xf32>
      %c7_66 = arith.constant 7 : index
      %463 = memref.load %arg3[%c7_66] : memref<19xf32, #tpu.memory_space<smem>>
      %c7_67 = arith.constant 7 : index
      %464 = memref.load %arg4[%c7_67] : memref<19xf32, #tpu.memory_space<smem>>
      %465 = vector.broadcast %463 : f32 to vector<8x8xf32>
      %466 = arith.mulf %48, %465 : vector<8x8xf32>
      %467 = math.exp %466 : vector<8x8xf32>
      %468 = vector.broadcast %464 : f32 to vector<8x8xf32>
      %469 = arith.mulf %468, %467 : vector<8x8xf32>
      %470 = arith.addf %462, %469 : vector<8x8xf32>
      %c8_68 = arith.constant 8 : index
      %471 = memref.load %arg3[%c8_68] : memref<19xf32, #tpu.memory_space<smem>>
      %c8_69 = arith.constant 8 : index
      %472 = memref.load %arg4[%c8_69] : memref<19xf32, #tpu.memory_space<smem>>
      %473 = vector.broadcast %471 : f32 to vector<8x8xf32>
      %474 = arith.mulf %48, %473 : vector<8x8xf32>
      %475 = math.exp %474 : vector<8x8xf32>
      %476 = vector.broadcast %472 : f32 to vector<8x8xf32>
      %477 = arith.mulf %476, %475 : vector<8x8xf32>
      %478 = arith.addf %470, %477 : vector<8x8xf32>
      %c9_70 = arith.constant 9 : index
      %479 = memref.load %arg3[%c9_70] : memref<19xf32, #tpu.memory_space<smem>>
      %c9_71 = arith.constant 9 : index
      %480 = memref.load %arg4[%c9_71] : memref<19xf32, #tpu.memory_space<smem>>
      %481 = vector.broadcast %479 : f32 to vector<8x8xf32>
      %482 = arith.mulf %48, %481 : vector<8x8xf32>
      %483 = math.exp %482 : vector<8x8xf32>
      %484 = vector.broadcast %480 : f32 to vector<8x8xf32>
      %485 = arith.mulf %484, %483 : vector<8x8xf32>
      %486 = arith.addf %478, %485 : vector<8x8xf32>
      %c10_72 = arith.constant 10 : index
      %487 = memref.load %arg3[%c10_72] : memref<19xf32, #tpu.memory_space<smem>>
      %c10_73 = arith.constant 10 : index
      %488 = memref.load %arg4[%c10_73] : memref<19xf32, #tpu.memory_space<smem>>
      %489 = vector.broadcast %487 : f32 to vector<8x8xf32>
      %490 = arith.mulf %48, %489 : vector<8x8xf32>
      %491 = math.exp %490 : vector<8x8xf32>
      %492 = vector.broadcast %488 : f32 to vector<8x8xf32>
      %493 = arith.mulf %492, %491 : vector<8x8xf32>
      %494 = arith.addf %486, %493 : vector<8x8xf32>
      %c11_74 = arith.constant 11 : index
      %495 = memref.load %arg3[%c11_74] : memref<19xf32, #tpu.memory_space<smem>>
      %c11_75 = arith.constant 11 : index
      %496 = memref.load %arg4[%c11_75] : memref<19xf32, #tpu.memory_space<smem>>
      %497 = vector.broadcast %495 : f32 to vector<8x8xf32>
      %498 = arith.mulf %48, %497 : vector<8x8xf32>
      %499 = math.exp %498 : vector<8x8xf32>
      %500 = vector.broadcast %496 : f32 to vector<8x8xf32>
      %501 = arith.mulf %500, %499 : vector<8x8xf32>
      %502 = arith.addf %494, %501 : vector<8x8xf32>
      %c12_76 = arith.constant 12 : index
      %503 = memref.load %arg3[%c12_76] : memref<19xf32, #tpu.memory_space<smem>>
      %c12_77 = arith.constant 12 : index
      %504 = memref.load %arg4[%c12_77] : memref<19xf32, #tpu.memory_space<smem>>
      %505 = vector.broadcast %503 : f32 to vector<8x8xf32>
      %506 = arith.mulf %48, %505 : vector<8x8xf32>
      %507 = math.exp %506 : vector<8x8xf32>
      %508 = vector.broadcast %504 : f32 to vector<8x8xf32>
      %509 = arith.mulf %508, %507 : vector<8x8xf32>
      %510 = arith.addf %502, %509 : vector<8x8xf32>
      %c13_78 = arith.constant 13 : index
      %511 = memref.load %arg3[%c13_78] : memref<19xf32, #tpu.memory_space<smem>>
      %c13_79 = arith.constant 13 : index
      %512 = memref.load %arg4[%c13_79] : memref<19xf32, #tpu.memory_space<smem>>
      %513 = vector.broadcast %511 : f32 to vector<8x8xf32>
      %514 = arith.mulf %48, %513 : vector<8x8xf32>
      %515 = math.exp %514 : vector<8x8xf32>
      %516 = vector.broadcast %512 : f32 to vector<8x8xf32>
      %517 = arith.mulf %516, %515 : vector<8x8xf32>
      %518 = arith.addf %510, %517 : vector<8x8xf32>
      %c14_80 = arith.constant 14 : index
      %519 = memref.load %arg3[%c14_80] : memref<19xf32, #tpu.memory_space<smem>>
      %c14_81 = arith.constant 14 : index
      %520 = memref.load %arg4[%c14_81] : memref<19xf32, #tpu.memory_space<smem>>
      %521 = vector.broadcast %519 : f32 to vector<8x8xf32>
      %522 = arith.mulf %48, %521 : vector<8x8xf32>
      %523 = math.exp %522 : vector<8x8xf32>
      %524 = vector.broadcast %520 : f32 to vector<8x8xf32>
      %525 = arith.mulf %524, %523 : vector<8x8xf32>
      %526 = arith.addf %518, %525 : vector<8x8xf32>
      %c15_82 = arith.constant 15 : index
      %527 = memref.load %arg3[%c15_82] : memref<19xf32, #tpu.memory_space<smem>>
      %c15_83 = arith.constant 15 : index
      %528 = memref.load %arg4[%c15_83] : memref<19xf32, #tpu.memory_space<smem>>
      %529 = vector.broadcast %527 : f32 to vector<8x8xf32>
      %530 = arith.mulf %48, %529 : vector<8x8xf32>
      %531 = math.exp %530 : vector<8x8xf32>
      %532 = vector.broadcast %528 : f32 to vector<8x8xf32>
      %533 = arith.mulf %532, %531 : vector<8x8xf32>
      %534 = arith.addf %526, %533 : vector<8x8xf32>
      %c16_84 = arith.constant 16 : index
      %535 = memref.load %arg3[%c16_84] : memref<19xf32, #tpu.memory_space<smem>>
      %c16_85 = arith.constant 16 : index
      %536 = memref.load %arg4[%c16_85] : memref<19xf32, #tpu.memory_space<smem>>
      %537 = vector.broadcast %535 : f32 to vector<8x8xf32>
      %538 = arith.mulf %48, %537 : vector<8x8xf32>
      %539 = math.exp %538 : vector<8x8xf32>
      %540 = vector.broadcast %536 : f32 to vector<8x8xf32>
      %541 = arith.mulf %540, %539 : vector<8x8xf32>
      %542 = arith.addf %534, %541 : vector<8x8xf32>
      %c17_86 = arith.constant 17 : index
      %543 = memref.load %arg3[%c17_86] : memref<19xf32, #tpu.memory_space<smem>>
      %c17_87 = arith.constant 17 : index
      %544 = memref.load %arg4[%c17_87] : memref<19xf32, #tpu.memory_space<smem>>
      %545 = vector.broadcast %543 : f32 to vector<8x8xf32>
      %546 = arith.mulf %48, %545 : vector<8x8xf32>
      %547 = math.exp %546 : vector<8x8xf32>
      %548 = vector.broadcast %544 : f32 to vector<8x8xf32>
      %549 = arith.mulf %548, %547 : vector<8x8xf32>
      %550 = arith.addf %542, %549 : vector<8x8xf32>
      %c18_88 = arith.constant 18 : index
      %551 = memref.load %arg3[%c18_88] : memref<19xf32, #tpu.memory_space<smem>>
      %c18_89 = arith.constant 18 : index
      %552 = memref.load %arg4[%c18_89] : memref<19xf32, #tpu.memory_space<smem>>
      %553 = vector.broadcast %551 : f32 to vector<8x8xf32>
      %554 = arith.mulf %48, %553 : vector<8x8xf32>
      %555 = math.exp %554 : vector<8x8xf32>
      %556 = vector.broadcast %552 : f32 to vector<8x8xf32>
      %557 = arith.mulf %556, %555 : vector<8x8xf32>
      %558 = arith.addf %550, %557 : vector<8x8xf32>
      %559 = vector.shape_cast %558 : vector<8x8xf32> to vector<1x8x8xf32>
      %cst_90 = arith.constant dense<0.000000e+00> : vector<1xf32>
      %560 = vector.multi_reduction <add>, %559, %cst_90 [1, 2] : vector<1x8x8xf32> to vector<1xf32>
      %561 = vector.shape_cast %560 : vector<1xf32> to vector<1x1x1xf32>
      %562 = vector.extract %561[0, 0, 0] : f32 from vector<1x1x1xf32>
      %563 = arith.subf %396, %400 : f32
      %564 = arith.subf %563, %562 : f32
      %cst_91 = arith.constant 2.000000e+00 : f32
      %565 = arith.mulf %cst_91, %564 : f32
      %566 = vector.broadcast %565 : f32 to vector<1x8x128xf32>
      %c0_92 = arith.constant 0 : index
      %c0_93 = arith.constant 0 : index
      %c0_94 = arith.constant 0 : index
      %567 = vector.load %arg13[%c0_92, %c0_93, %c0_94] : memref<1x8x128xf32, #tpu.memory_space<vmem>>, vector<1x8x128xf32>
      tpu.vector_store %arg13[%c0_92, %c0_93, %c0_94], %566 {strides = array<i32>} : memref<1x8x128xf32, #tpu.memory_space<vmem>>, vector<1x8x128xf32>,
    } else {
    }
    return
  }
  func.func @transform_0(%arg0: i32, %arg1: memref<1xi32, #tpu.memory_space<smem>>, %arg2: memref<1xi32, #tpu.memory_space<smem>>, %arg3: memref<19xf32, #tpu.memory_space<smem>>, %arg4: memref<19xf32, #tpu.memory_space<smem>>) -> (i32, i32) {
    %0 = arith.index_cast %arg0 : i32 to index
    %1 = memref.load %arg1[%0] : memref<1xi32, #tpu.memory_space<smem>>
    %c0_i32 = arith.constant 0 : i32
    %c0_i32_0 = arith.constant 0 : i32
    return %1, %c0_i32 : i32, i32
  }
  func.func @transform_1(%arg0: i32, %arg1: memref<1xi32, #tpu.memory_space<smem>>, %arg2: memref<1xi32, #tpu.memory_space<smem>>, %arg3: memref<19xf32, #tpu.memory_space<smem>>, %arg4: memref<19xf32, #tpu.memory_space<smem>>) -> (i32, i32) {
    %0 = arith.index_cast %arg0 : i32 to index
    %1 = memref.load %arg1[%0] : memref<1xi32, #tpu.memory_space<smem>>
    %c0_i32 = arith.constant 0 : i32
    %c0_i32_0 = arith.constant 0 : i32
    return %1, %c0_i32 : i32, i32
  }
  func.func @transform_2(%arg0: i32, %arg1: memref<1xi32, #tpu.memory_space<smem>>, %arg2: memref<1xi32, #tpu.memory_space<smem>>, %arg3: memref<19xf32, #tpu.memory_space<smem>>, %arg4: memref<19xf32, #tpu.memory_space<smem>>) -> (i32, i32) {
    %0 = arith.index_cast %arg0 : i32 to index
    %1 = memref.load %arg2[%0] : memref<1xi32, #tpu.memory_space<smem>>
    %c0_i32 = arith.constant 0 : i32
    %c0_i32_0 = arith.constant 0 : i32
    return %c0_i32, %1 : i32, i32
  }
  func.func @transform_3(%arg0: i32, %arg1: memref<1xi32, #tpu.memory_space<smem>>, %arg2: memref<1xi32, #tpu.memory_space<smem>>, %arg3: memref<19xf32, #tpu.memory_space<smem>>, %arg4: memref<19xf32, #tpu.memory_space<smem>>) -> (i32, i32) {
    %0 = arith.index_cast %arg0 : i32 to index
    %1 = memref.load %arg2[%0] : memref<1xi32, #tpu.memory_space<smem>>
    %c0_i32 = arith.constant 0 : i32
    %c0_i32_0 = arith.constant 0 : i32
    return %c0_i32, %1 : i32, i32
  }
  func.func @transform_4(%arg0: i32, %arg1: memref<1xi32, #tpu.memory_space<smem>>, %arg2: memref<1xi32, #tpu.memory_space<smem>>, %arg3: memref<19xf32, #tpu.memory_space<smem>>, %arg4: memref<19xf32, #tpu.memory_space<smem>>) -> (i32, i32) {
    %0 = arith.index_cast %arg0 : i32 to index
    %1 = memref.load %arg1[%0] : memref<1xi32, #tpu.memory_space<smem>>
    %c0_i32 = arith.constant 0 : i32
    %c0_i32_0 = arith.constant 0 : i32
    return %1, %c0_i32 : i32, i32
  }
  func.func @transform_5(%arg0: i32, %arg1: memref<1xi32, #tpu.memory_space<smem>>, %arg2: memref<1xi32, #tpu.memory_space<smem>>, %arg3: memref<19xf32, #tpu.memory_space<smem>>, %arg4: memref<19xf32, #tpu.memory_space<smem>>) -> (i32, i32) {
    %0 = arith.index_cast %arg0 : i32 to index
    %1 = memref.load %arg1[%0] : memref<1xi32, #tpu.memory_space<smem>>
    %c0_i32 = arith.constant 0 : i32
    %c0_i32_0 = arith.constant 0 : i32
    return %1, %c0_i32 : i32, i32
  }
  func.func @transform_6(%arg0: i32, %arg1: memref<1xi32, #tpu.memory_space<smem>>, %arg2: memref<1xi32, #tpu.memory_space<smem>>, %arg3: memref<19xf32, #tpu.memory_space<smem>>, %arg4: memref<19xf32, #tpu.memory_space<smem>>) -> (i32, i32) {
    %0 = arith.index_cast %arg0 : i32 to index
    %1 = memref.load %arg2[%0] : memref<1xi32, #tpu.memory_space<smem>>
    %c0_i32 = arith.constant 0 : i32
    %c0_i32_0 = arith.constant 0 : i32
    return %c0_i32, %1 : i32, i32
  }
  func.func @transform_7(%arg0: i32, %arg1: memref<1xi32, #tpu.memory_space<smem>>, %arg2: memref<1xi32, #tpu.memory_space<smem>>, %arg3: memref<19xf32, #tpu.memory_space<smem>>, %arg4: memref<19xf32, #tpu.memory_space<smem>>) -> (i32, i32) {
    %0 = arith.index_cast %arg0 : i32 to index
    %1 = memref.load %arg2[%0] : memref<1xi32, #tpu.memory_space<smem>>
    %c0_i32 = arith.constant 0 : i32
    %c0_i32_0 = arith.constant 0 : i32
    return %c0_i32, %1 : i32, i32
  }
  func.func @transform_8(%arg0: i32, %arg1: memref<1xi32, #tpu.memory_space<smem>>, %arg2: memref<1xi32, #tpu.memory_space<smem>>, %arg3: memref<19xf32, #tpu.memory_space<smem>>, %arg4: memref<19xf32, #tpu.memory_space<smem>>) -> (i32, i32, i32) {
    %c0_i32 = arith.constant 0 : i32
    %c0_i32_0 = arith.constant 0 : i32
    %c0_i32_1 = arith.constant 0 : i32
    return %arg0, %c0_i32, %c0_i32_0 : i32, i32, i32
  }
}

</mosaic_0001>

<bundles_post_ra>
// kernel: tpu_custom_call.1
= control target key start
LH: loop header
LB: loop body
LE: loop exit
PB: predicated region body
PF: predicated region fallthrough
CT: control target
= control target key end

     0   :  { %s2125_s0 = inlined_call_operand.<no memory space> [shape: s32[1], index: 0, kind: input, shape index: {}]   ;;  %s2126_s1 = inlined_call_operand.<no memory space> [shape: s32[1], index: 1, kind: input, shape index: {}]   ;;  %s2127_s2 = inlined_call_operand.vmem [shape: f32[19], index: 2, kind: input, shape index: {}]   ;;  %s2128_s4 = inlined_call_operand.vmem [shape: f32[8,32], index: 4, kind: input, shape index: {}]   ;;  %s2129_s5 = inlined_call_operand.vmem [shape: f32[8,32], index: 5, kind: input, shape index: {}]   ;;  %s2130_s6 = inlined_call_operand.vmem [shape: f32[32,8], index: 6, kind: input, shape index: {}]   ;;  %s2131_s7 = inlined_call_operand.vmem [shape: f32[32,8], index: 7, kind: input, shape index: {}]   ;;  %s2132_s8 = inlined_call_operand.vmem [shape: f32[8,1], index: 8, kind: input, shape index: {}]   ;;  %s2133_s9 = inlined_call_operand.vmem [shape: f32[8,1], index: 9, kind: input, shape index: {}]   ;;  %s2134_s10 = inlined_call_operand.vmem [shape: f32[1,8], index: 10, kind: input, shape index: {}]   ;;  %s2135_s11 = inlined_call_operand.vmem [shape: f32[1,8], index: 11, kind: input, shape index: {}]   ;;  %s2136_s12 = inlined_call_operand.hbm [shape: f32[1,8,128], index: 12, kind: output, shape index: {}]   ;;  %s2137_s3 = inlined_call_operand.vmem [shape: f32[19], index: 3, kind: input, shape index: {}]  }
   0x1   :  { %2140 = sst [smem:[#allocation11_spill]] %s2136_s12  ;;  %s19_s23 = sshll.u32 %s2127_s2, 4  ;;  %s20_s23 = int_to_ptr.vmem [resolvable:$true] %s19_s23 }
   0x2   :  { %s23_s26 = sshll.u32 %s2137_s3, 4  ;;  %s1474_s27 = scalar_lea.vmem %s20_s23, 16  ;;  %s24_s26 = int_to_ptr.vmem [resolvable:$true] %s23_s26 }
   0x3   :  { %p1475_p0 = scmp.ne.s32.totalorder %s20_s23, %s1474_s27  ;;  %p1479_p1 = scmp.lt.s32.totalorder %s20_s23, %s20_s23 }
   0x4   :  { %p1480_p2 = scmp.lt.s32.totalorder %s1474_s27, %s1474_s27 }
   0x6   :  { %p1481_p3 = por %p1480_p2, %p1479_p1 }
   0x8   :  { %p1482_p4 = pnand %p1481_p3, %p1475_p0 }
   0xa   :  { %1485 = shalt.err (!%p1482_p4)  }
   0xb   :  { %s1524_s28 = smov [#allocation5]   ;;  %s1486_s29 = scalar_lea.vmem %s24_s26, 16 }
   0xc   :  { %22 = dma.vmem_to_smem %s20_s23, 16, %s1524_s28, [#allocation2] }
   0xd   :  { %p1487_p5 = scmp.ne.s32.totalorder %s24_s26, %s1486_s29  ;;  %p1491_p6 = scmp.lt.s32.totalorder %s24_s26, %s24_s26 }
   0xe   :  { %p1492_p7 = scmp.lt.s32.totalorder %s1486_s29, %s1486_s29 }
  0x10   :  { %p1493_p8 = por %p1492_p7, %p1491_p6 }
  0x12   :  { %p1494_p9 = pnand %p1493_p8, %p1487_p5 }
  0x14   :  { %1497 = shalt.err (!%p1494_p9)  }
  0x15   :  { %s1525_s2 = smov [#allocation6]  }
  0x16   :  { %26 = dma.vmem_to_smem %s24_s26, 16, %s1525_s2, [#allocation2] }
  0x17   :  { %1520 = dma.done.wait [#allocation2], 32 }
  0x18   :  { %1521 = vsyncadd [#allocation2], 4294967264 }
  0x19   :  { %28 = sfence }
  0x1a   :  { %29 = vsyncpa [#allocation8], 0  ;;  %p143_p10 = scmp.lt.s32.totalorder %s2126_s1, 0  ;;  %v1526_v0 = vmov 0.0|0.0   ;;  %p131_p11 = scmp.lt.s32.totalorder %s2125_s0, 0  ;;  %vm1527_vm0 = vmmov 0  }
  0x1b   :  { %1284 = vmatprep.subr.bf16.mxu0 %v1526_v0  ;;  %1290 = vmatprep.subr.bf16.mxu1 %v1526_v0  ;;  %v1528_v1 = vmov 0.0   ;;  %v1529_v2 = vmov 0   ;;  %vm193_vm1 = vcmask 261120   ;;  %s518_s22 = sld [smem:[#allocation5]]  ;;  %s1146_s23 = sld [smem:[#allocation5 + $0x1]]  ;;  %vm860_vm2 = vcmask 64512  }
  0x1c   :  { %s1611_s17 = scalar_select %p143_p10, %s2126_s1, 0  ;;  %1248 = vmatprep.mubr.msk.f32.mxu0 %vm1527_vm0, %v1528_v1  ;;  %1259 = vmatprep.mubr.msk.f32.mxu1 %vm1527_vm0, %v1528_v1 }
  0x1d   :  { %s132_s20 = scalar_select %p131_p11, %s2125_s0, 0  ;;  %1321 = vset.pattern.permute.xlu0 %v1529_v2 }
  0x1e   :  { %s1136_s21 = sshll.u32 %s1611_s17, 3  ;;  %s1150_s25 = sld [smem:[#allocation5 + $0x3]] }
  0x1f   :  { %s146_s24 = scalar_lea.vmem %s2130_s6, %s1136_s21  ;;  %s152_s27 = scalar_lea.vmem %s2131_s7, %s1136_s21 }
  0x20   :  { %v181_v3 = vld [vmem:[%s146_s24] sm:$0xff]  ;;  %v182_v4 = vld [vmem:[%s146_s24 + $0x8] sm:$0xff]  ;;  %v183_v8 = vld [vmem:[%s146_s24 + $0x10] sm:$0xff]  ;;  %s1134_s28 = sshll.u32 %s132_s20, 3  ;;  %s174_s21 = scalar_lea.vmem %s2135_s11, %s1611_s17 }
  0x21   :  { %v185_v5 = vld [vmem:[%s152_s27] sm:$0xff]  ;;  %v1285_v6 = vpack.c.bf16 %v182_v4, %v181_v3  ;;  %v186_v7 = vld [vmem:[%s152_s27 + $0x8] sm:$0xff]  ;;  %v184_v9 = vld [vmem:[%s146_s24 + $0x18] sm:$0xff]  ;;  %s158_s3 = scalar_lea.vmem %s2132_s8, %s1134_s28  ;;  %s164_s30 = scalar_lea.vmem %s2133_s9, %s1134_s28  ;;  %v1693_v24 = vstv %s518_s22 }
  0x22   :  { %v1291_v10 = vpack.c.bf16 %v186_v7, %v185_v5  ;;  %v187_v11 = vld [vmem:[%s152_s27 + $0x10] sm:$0xff]  ;;  %v188_v12 = vld [vmem:[%s152_s27 + $0x18] sm:$0xff]  ;;  %v1288_v13 = vpack.c.bf16 %v184_v9, %v183_v8  ;;  %v189_v14 = vld [vmem:[%s158_s3] sm:$0xff]  ;;  %s134_s15 = scalar_lea.vmem %s2128_s4, %s1134_s28  ;;  %s140_s19 = scalar_lea.vmem %s2129_s5, %s1134_s28  ;;  %v1695_v25 = vstv %s1146_s23 }
  0x23   :  { %1286 = vmatpush3.bf16.msra.mxu0 %v1285_v6  ;;  %v1294_v15 = vpack.c.bf16 %v188_v12, %v187_v11  ;;  %482 = vperm.xlu0 %1321, %v189_v14   ;;  %v190_v16 = vld [vmem:[%s164_s30] sm:$0xff]  ;;  %s169_s8 = scalar_lea.vmem %s2134_s10, %s1611_s17  ;;  %s1148_s24 = sld [smem:[#allocation5 + $0x2]] }
  0x24   :  { %1292 = vmatpush3.bf16.msra.mxu1 %v1291_v10  ;;  %1287 = vmatprep.subr.bf16.mxu0 %v1526_v0  ;;  %v179_v17 = vld [vmem:[%s134_s15] sm:$0xff]  ;;  %s1152_s26 = sld [smem:[#allocation5 + $0x4]]  ;;  %s1154_s27 = sld [smem:[#allocation5 + $0x5]]  ;;  %v1703_v27 = vstv %s1150_s25 }
  0x25   :  { %1293 = vmatprep.subr.bf16.mxu1 %v1526_v0  ;;  %v180_v18 = vld [vmem:[%s140_s19] sm:$0xff]  ;;  %s1156_s28 = sld [smem:[#allocation5 + $0x6]]  ;;  %s1655_s29 = sld [smem:[#allocation5 + $0x7]] }
  0x26   :  { %v1144_v20 = vld [vmem:[%s169_s8] ss:$0 sm:$0xff]  ;;  %s1657_s10 = sld [smem:[#allocation6]]  ;;  %s1661_s3 = sld [smem:[#allocation6 + $0x1]] }
  0x27   :  { %1289 = vmatpush3.bf16.msra.mxu0 %v1288_v13  ;;  %497 = vperm.xlu0 %1321, %v190_v16   ;;  %s1659_s2 = sld [smem:[#allocation5 + $0x8]]  ;;  %s1663_s6 = sld [smem:[#allocation5 + $0x9]]  ;;  %v1145_v23 = vld [vmem:[%s174_s21] ss:$0 sm:$0xff] }
  0x28   :  { %1295 = vmatpush3.bf16.msra.mxu1 %v1294_v15  ;;  %1296 = vmatprep.subr.bf16.mxu0 %v1526_v0  ;;  %s1665_s7 = sld [smem:[#allocation6 + $0x2]]  ;;  %s1669_s17 = sld [smem:[#allocation6 + $0x3]] }
  0x29   :  { %1302 = vmatprep.subr.bf16.mxu1 %v1526_v0  ;;  %s1667_s11 = sld [smem:[#allocation5 + $0xa]]  ;;  %s1671_s30 = sld [smem:[#allocation5 + $0xb]]  ;;  %v1697_v26 = vstv %s1148_s24 }
  0x2a   :  { %1249 = vmatmul.mubr.msk.f32.vlgmr.msra.gmra.mrb[0].mxu0 %vm193_vm1, %v179_v17  ;;  %s1673_s13 = sld [smem:[#allocation6 + $0x4]]  ;;  %s1677_s15 = sld [smem:[#allocation6 + $0x5]]  ;;  %v1705_v28 = vstv %s1152_s26  ;;  %v1707_v29 = vstv %s1154_s27 }
  0x2b   :  { %1260 = vmatmul.mubr.msk.f32.vlgmr.msra.gmra.mrb[0].mxu1 %vm193_vm1, %v180_v18  ;;  %1298 = vmatpush3.bf16.msra.mxu0 %v1291_v10  ;;  %s1675_s14 = sld [smem:[#allocation5 + $0xc]]  ;;  %s1679_s16 = sld [smem:[#allocation5 + $0xd]]  ;;  %v1709_v30 = vstv %s1156_s28  ;;  %v1717_v32 = vstv %s1655_s29 }
  0x2c   :  { %1304 = vmatpush3.bf16.msra.mxu1 %v1285_v6  ;;  %1299 = vmatprep.subr.bf16.mxu0 %v1526_v0  ;;  %s1681_s18 = sld [smem:[#allocation6 + $0x6]]  ;;  %s1685_s4 = sld [smem:[#allocation6 + $0x7]]  ;;  %v531_v31 = vstv %s1657_s10  ;;  %v2139_v36 = vstv %s1661_s3 }
  0x2d   :  { %1305 = vmatprep.subr.bf16.mxu1 %v1526_v0  ;;  %1270 = vmatprep.mubr.msk.f32.mxu0 %vm1527_vm0, %v1528_v1  ;;  %s1683_s19 = sld [smem:[#allocation5 + $0xe]]  ;;  %s1687_s5 = sld [smem:[#allocation5 + $0xf]]  ;;  %v1720_v33 = vstv %s1659_s2  ;;  %v1723_v34 = vstv %s1663_s6 }
  0x2e   :  { %1281 = vmatprep.mubr.msk.f32.mxu1 %vm1527_vm0, %v1528_v1  ;;  %s1689_s8 = sld [smem:[#allocation6 + $0x8]]  ;;  %s1699_s20 = sld [smem:[#allocation6 + $0x9]]  ;;  %v567_v37 = vstv %s1665_s7  ;;  %v585_v44 = vstv %s1669_s17 }
  0x2f   :  { %1301 = vmatpush3.bf16.msra.mxu0 %v1294_v15  ;;  %s1691_s9 = sld [smem:[#allocation5 + $0x10]]  ;;  %s1701_s12 = sld [smem:[#allocation5 + $0x11]]  ;;  %v1730_v38 = vstv %s1667_s11  ;;  %v1733_v39 = vstv %s1671_s30 }
  0x30   :  { %1307 = vmatpush3.bf16.msra.mxu1 %v1288_v13  ;;  %s1711_s21 = sld [smem:[#allocation6 + $0xa]]  ;;  %s1725_s23 = sld [smem:[#allocation6 + $0xb]]  ;;  %v603_v49 = vstv %s1673_s13  ;;  %v621_v52 = vstv %s1677_s15 }
  0x31   :  { %s1713_s22 = sld [smem:[#allocation5 + $0x12]]  ;;  %s1735_s24 = sld [smem:[#allocation6 + $0xc]]  ;;  %v1740_v45 = vstv %s1675_s14  ;;  %v1744_v50 = vstv %s1679_s16 }
  0x32   :  { %1271 = vmatmul.mubr.msk.f32.vlgmr.msra.gmra.mrb[2].mxu0 %vm193_vm1, %v179_v17  ;;  %v639_v56 = vstv %s1681_s18  ;;  %v657_v57 = vstv %s1685_s4  ;;  %s1877_s25 = sld [smem:[#allocation6 + $0xe]]  ;;  %s1883_s26 = sld [smem:[#allocation6 + $0xf]] }
  0x33   :  { %1282 = vmatmul.mubr.msk.f32.vlgmr.msra.gmra.mrb[2].mxu1 %vm193_vm1, %v180_v18  ;;  %v1748_v53 = vstv %s1683_s19  ;;  %v1751_v54 = vstv %s1687_s5  ;;  %s1891_s27 = sld [smem:[#allocation6 + $0x10]]  ;;  %s1898_s28 = sld [smem:[#allocation6 + $0x11]] }
  0x34   :  { %v675_v61 = vstv %s1689_s8  ;;  %v693_v0 = vstv %s1699_s20  ;;  %s1905_s29 = sld [smem:[#allocation6 + $0x12]]  ;;  %p1182_p12 = scmp.ne.s32.totalorder %s2125_s0, %s2126_s1 }
  0x35   :  { %v1756_v58 = vstv %s1691_s9  ;;  %v1763_v62 = vstv %s1701_s12  ;;  %s1869_s12 = sld [smem:[#allocation6 + $0xd]] }
  0x36   :  { %v711_v1 = vstv %s1711_s21  ;;  %v729_v6 = vstv %s1725_s23 }
  0x37   :  { %v1770_v2 = vstv %s1713_s22 }
  0xa2   :  { %v1647_v19 = vpop.permute.xlu0 %482 }
  0xa3   :  { %v491_v40 = vadd.f32 %v1144_v20, %v1647_v19  ;;  %v510_v59 = vadd.f32 %v1145_v23, %v1647_v19 }
  0xa6   :  { %v498_v21 = vpop.permute.xlu0 %497 }
  0xa7   :  { %v1649_v22 = vadd.f32 %v1144_v20, %v498_v21  ;;  %v506_v46 = vadd.f32 %v1145_v23, %v498_v21 }
  0xfd   :  { %v263_v35 = vpop.f32.mrb[0].mxu0 }
  0xfe   :  { %v492_v41 = vmul.f32 2.0, %v263_v35  ;;  %v336_v42 = vpop.f32.mrb[0].mxu1  ;;  %v1250_v43 = vpop.f32.mrb[1].mxu0 }
  0xff   :  { %v507_v47 = vmul.f32 2.0, %v336_v42  ;;  %v1261_v48 = vpop.f32.mrb[1].mxu1 }
 0x100   :  { %v493_v51 = vsub.f32 %v491_v40, %v492_v41 }
 0x101   :  { %v508_v55 = vsub.f32 %v506_v46, %v507_v47 }
 0x102   :  { %v1759_v60 = vmax.f32 %v493_v51, 0.0 }
 0x103   :  { %v1765_v63 = vmax.f32 %v508_v55, 0.0 }
 0x104   :  { %v521_v3 = vmul.f32 %v1693_v24, %v1759_v60  ;;  %v539_v4 = vmul.f32 %v1695_v25, %v1759_v60  ;;  %v557_v5 = vmul.f32 %v1697_v26, %v1759_v60  ;;  %v575_v16 = vmul.f32 %v1703_v27, %v1759_v60 }
 0x105   :  { %v406_v7 = vpop.f32.mrb[2].mxu0  ;;  %v524_v8 = vmul.f32 %v1693_v24, %v1765_v63  ;;  %v542_v9 = vmul.f32 %v1695_v25, %v1765_v63  ;;  %v560_v10 = vmul.f32 %v1697_v26, %v1765_v63  ;;  %v578_v17 = vmul.f32 %v1703_v27, %v1765_v63 }
 0x106   :  { %v511_v12 = vmul.f32 2.0, %v406_v7  ;;  %v476_v13 = vpop.f32.mrb[2].mxu1  ;;  %v1272_v14 = vpop.f32.mrb[3].mxu0  ;;  %v522_v15 = vmul.f32 1.442695, %v521_v3  ;;  %v593_v21 = vmul.f32 %v1705_v28, %v1759_v60  ;;  %v596_v46 = vmul.f32 %v1705_v28, %v1765_v63 }
 0x107   :  { %v515_v18 = vmul.f32 2.0, %v476_v13  ;;  %v525_v19 = vmul.f32 1.442695, %v524_v8  ;;  %v540_v20 = vmul.f32 1.442695, %v539_v4  ;;  %v1283_v23 = vpop.f32.mrb[3].mxu1  ;;  %v611_v51 = vmul.f32 %v1707_v29, %v1759_v60 }
 0x108   :  { %v512_v35 = vsub.f32 %v510_v59, %v511_v12  ;;  %1322 = vpow2.f32 %v522_v15  ;;  %v543_v40 = vmul.f32 1.442695, %v542_v9  ;;  %v558_v41 = vmul.f32 1.442695, %v557_v5 }
 0x109   :  { %v516_v42 = vsub.f32 %v1649_v22, %v515_v18  ;;  %1324 = vpow2.f32 %v525_v19  ;;  %v561_v43 = vmul.f32 1.442695, %v560_v10  ;;  %v576_v48 = vmul.f32 1.442695, %v575_v16 }
 0x10a   :  { %v1795_v47 = vmax.f32 %v512_v35, 0.0  ;;  %1326 = vpow2.f32 %v540_v20  ;;  %v579_v59 = vmul.f32 1.442695, %v578_v17  ;;  %v594_v3 = vmul.f32 1.442695, %v593_v21 }
 0x10b   :  { %v1799_v55 = vmax.f32 %v516_v42, 0.0  ;;  %1328 = vpow2.f32 %v543_v40  ;;  %v614_v22 = vmul.f32 %v1707_v29, %v1765_v63  ;;  %v629_v4 = vmul.f32 %v1709_v30, %v1759_v60 }
 0x10c   :  { %1330 = vpow2.f32 %v558_v41  ;;  %v632_v5 = vmul.f32 %v1709_v30, %v1765_v63  ;;  %v597_v7 = vmul.f32 1.442695, %v596_v46  ;;  %v647_v8 = vmul.f32 %v1717_v32, %v1759_v60 }
 0x10d   :  { %1332 = vpow2.f32 %v561_v43  ;;  %v650_v9 = vmul.f32 %v1717_v32, %v1765_v63  ;;  %v612_v10 = vmul.f32 1.442695, %v611_v51  ;;  %v615_v12 = vmul.f32 1.442695, %v614_v22 }
 0x10e   :  { %1334 = vpow2.f32 %v576_v48  ;;  %v665_v13 = vmul.f32 %v1720_v33, %v1759_v60  ;;  %v630_v14 = vmul.f32 1.442695, %v629_v4  ;;  %v633_v15 = vmul.f32 1.442695, %v632_v5 }
 0x10f   :  { %1336 = vpow2.f32 %v579_v59  ;;  %v648_v16 = vmul.f32 1.442695, %v647_v8  ;;  %v668_v17 = vmul.f32 %v1720_v33, %v1765_v63  ;;  %v683_v18 = vmul.f32 %v1723_v34, %v1759_v60 }
 0x110   :  { %1338 = vpow2.f32 %v594_v3  ;;  %v686_v19 = vmul.f32 %v1723_v34, %v1765_v63  ;;  %v651_v20 = vmul.f32 1.442695, %v650_v9  ;;  %v701_v21 = vmul.f32 %v1730_v38, %v1759_v60 }
 0x111   :  { %1340 = vpow2.f32 %v597_v7  ;;  %v704_v23 = vmul.f32 %v1730_v38, %v1765_v63  ;;  %v666_v40 = vmul.f32 1.442695, %v665_v13  ;;  %v669_v41 = vmul.f32 1.442695, %v668_v17 }
 0x112   :  { %v1323_v35 = vpop.eup %1322  ;;  %1342 = vpow2.f32 %v612_v10  ;;  %v719_v42 = vmul.f32 %v1733_v39, %v1759_v60  ;;  %v684_v46 = vmul.f32 1.442695, %v683_v18  ;;  %v687_v48 = vmul.f32 1.442695, %v686_v19 }
 0x113   :  { %v1325_v43 = vpop.eup %1324  ;;  %1344 = vpow2.f32 %v615_v12  ;;  %v702_v51 = vmul.f32 1.442695, %v701_v21  ;;  %v722_v22 = vmul.f32 %v1733_v39, %v1765_v63  ;;  %v737_v4 = vmul.f32 %v1740_v45, %v1759_v60 }
 0x114   :  { %v1327_v59 = vpop.eup %1326  ;;  %v530_v3 = vadd.f32 %v1325_v43, %v1323_v35  ;;  %1346 = vpow2.f32 %v630_v14  ;;  %v705_v7 = vmul.f32 1.442695, %v704_v23  ;;  %v740_v8 = vmul.f32 %v1740_v45, %v1765_v63 }
 0x115   :  { %v1329_v5 = vpop.eup %1328  ;;  %1348 = vpow2.f32 %v633_v15  ;;  %v755_v9 = vmul.f32 %v1744_v50, %v1759_v60  ;;  %v720_v14 = vmul.f32 1.442695, %v719_v42  ;;  %v723_v18 = vmul.f32 1.442695, %v722_v22 }
 0x116   :  { %v1331_v10 = vpop.eup %1330  ;;  %v532_v12 = vmul.f32 %v531_v31, %v530_v3  ;;  %v548_v13 = vadd.f32 %v1329_v5, %v1327_v59  ;;  %1350 = vpow2.f32 %v648_v16  ;;  %v738_v19 = vmul.f32 1.442695, %v737_v4 }
 0x117   :  { %v1333_v17 = vpop.eup %1332  ;;  %1352 = vpow2.f32 %v651_v20  ;;  %v758_v15 = vmul.f32 %v1744_v50, %v1765_v63  ;;  %v741_v43 = vmul.f32 1.442695, %v740_v8  ;;  %v756_v59 = vmul.f32 1.442695, %v755_v9 }
 0x118   :  { %v1335_v21 = vpop.eup %1334  ;;  %v550_v23 = vmul.f32 %v2139_v36, %v548_v13  ;;  %v566_v35 = vadd.f32 %v1333_v17, %v1331_v10  ;;  %1354 = vpow2.f32 %v666_v40  ;;  %v773_v16 = vmul.f32 %v1748_v53, %v1759_v60 }
 0x119   :  { %v1337_v11 = vpop.eup %1336  ;;  %1356 = vpow2.f32 %v669_v41  ;;  %v776_v20 = vmul.f32 %v1748_v53, %v1765_v63  ;;  %v759_v40 = vmul.f32 1.442695, %v758_v15  ;;  %v791_v41 = vmul.f32 %v1751_v54, %v1759_v60 }
 0x11a   :  { %v1339_v42 = vpop.eup %1338  ;;  %v551_v3 = vadd.f32 %v550_v23, %v532_v12  ;;  %v568_v22 = vmul.f32 %v567_v37, %v566_v35  ;;  %v584_v4 = vadd.f32 %v1337_v11, %v1335_v21  ;;  %1358 = vpow2.f32 %v684_v46 }
 0x11b   :  { %v1341_v5 = vpop.eup %1340  ;;  %1360 = vpow2.f32 %v687_v48  ;;  %v774_v8 = vmul.f32 1.442695, %v773_v16  ;;  %v777_v12 = vmul.f32 1.442695, %v776_v20  ;;  %v794_v11 = vmul.f32 %v1751_v54, %v1765_v63 }
 0x11c   :  { %v1343_v9 = vpop.eup %1342  ;;  %v569_v10 = vadd.f32 %v568_v22, %v551_v3  ;;  %v586_v13 = vmul.f32 %v585_v44, %v584_v4  ;;  %v602_v17 = vadd.f32 %v1341_v5, %v1339_v42  ;;  %1362 = vpow2.f32 %v702_v51 }
 0x11d   :  { %v1345_v36 = vpop.eup %1344  ;;  %1364 = vpow2.f32 %v705_v7  ;;  %v809_v46 = vmul.f32 %v1756_v58, %v1759_v60  ;;  %v792_v51 = vmul.f32 1.442695, %v791_v41  ;;  %v795_v16 = vmul.f32 1.442695, %v794_v11 }
 0x11e   :  { %v1347_v48 = vpop.eup %1346  ;;  %v587_v15 = vadd.f32 %v586_v13, %v569_v10  ;;  %v604_v21 = vmul.f32 %v603_v49, %v602_v17  ;;  %v620_v23 = vadd.f32 %v1345_v36, %v1343_v9  ;;  %1366 = vpow2.f32 %v720_v14 }
 0x11f   :  { %v1349_v35 = vpop.eup %1348  ;;  %1368 = vpow2.f32 %v723_v18  ;;  %v812_v7 = vmul.f32 %v1756_v58, %v1765_v63  ;;  %v810_v5 = vmul.f32 1.442695, %v809_v46  ;;  %v827_v36 = vmul.f32 %v1763_v62, %v1759_v60 }
 0x120   :  { %v1351_v20 = vpop.eup %1350  ;;  %v605_v42 = vadd.f32 %v604_v21, %v587_v15  ;;  %v622_v3 = vmul.f32 %v621_v52, %v620_v23  ;;  %v638_v22 = vadd.f32 %v1349_v35, %v1347_v48  ;;  %1370 = vpow2.f32 %v738_v19 }
 0x121   :  { %v1353_v4 = vpop.eup %1352  ;;  %1372 = vpow2.f32 %v741_v43  ;;  %v830_v14 = vmul.f32 %v1763_v62, %v1765_v63  ;;  %v813_v17 = vmul.f32 1.442695, %v812_v7  ;;  %v828_v19 = vmul.f32 1.442695, %v827_v36 }
 0x122   :  { %v1355_v18 = vpop.eup %1354  ;;  %v623_v41 = vadd.f32 %v622_v3, %v605_v42  ;;  %v640_v9 = vmul.f32 %v639_v56, %v638_v22  ;;  %v656_v10 = vadd.f32 %v1353_v4, %v1351_v20  ;;  %1374 = vpow2.f32 %v756_v59 }
 0x123   :  { %v1357_v13 = vpop.eup %1356  ;;  %1376 = vpow2.f32 %v759_v40  ;;  %v845_v43 = vmul.f32 %v1770_v2, %v1759_v60  ;;  %v831_v23 = vmul.f32 1.442695, %v830_v14  ;;  %v848_v59 = vmul.f32 %v1770_v2, %v1765_v63 }
 0x124   :  { %v1359_v11 = vpop.eup %1358  ;;  %v641_v46 = vadd.f32 %v640_v9, %v623_v41  ;;  %v658_v48 = vmul.f32 %v657_v57, %v656_v10  ;;  %v674_v15 = vadd.f32 %v1357_v13, %v1355_v18  ;;  %1378 = vpow2.f32 %v774_v8 }
 0x125   :  { %v1361_v21 = vpop.eup %1360  ;;  %1380 = vpow2.f32 %v777_v12  ;;  %v527_v40 = vmul.f32 %v1693_v24, %v1795_v47  ;;  %v846_v8 = vmul.f32 1.442695, %v845_v43  ;;  %v849_v12 = vmul.f32 1.442695, %v848_v59 }
 0x126   :  { %v1363_v35 = vpop.eup %1362  ;;  %v659_v60 = vadd.f32 %v658_v48, %v641_v46  ;;  %v676_v7 = vmul.f32 %v675_v61, %v674_v15  ;;  %v692_v20 = vadd.f32 %v1361_v21, %v1359_v11  ;;  %1382 = vpow2.f32 %v792_v51 }
 0x127   :  { %v1365_v42 = vpop.eup %1364  ;;  %1384 = vpow2.f32 %v795_v16  ;;  %v545_v3 = vmul.f32 %v1695_v25, %v1795_v47  ;;  %v528_v51 = vmul.f32 1.442695, %v527_v40  ;;  %v563_v16 = vmul.f32 %v1697_v26, %v1795_v47 }
 0x128   :  { %v1367_v63 = vpop.eup %1366  ;;  %v677_v22 = vadd.f32 %v676_v7, %v659_v60  ;;  %v694_v24 = vmul.f32 %v693_v0, %v692_v20  ;;  %v710_v4 = vadd.f32 %v1365_v42, %v1363_v35  ;;  %1386 = vpow2.f32 %v810_v5 }
 0x129   :  { %v1369_v36 = vpop.eup %1368  ;;  %1388 = vpow2.f32 %v813_v17  ;;  %v581_v14 = vmul.f32 %v1703_v27, %v1795_v47  ;;  %v546_v10 = vmul.f32 1.442695, %v545_v3  ;;  %v564_v13 = vmul.f32 1.442695, %v563_v16 }
 0x12a   :  { %v1371_v18 = vpop.eup %1370  ;;  %v695_v25 = vadd.f32 %v694_v24, %v677_v22  ;;  %v712_v41 = vmul.f32 %v711_v1, %v710_v4  ;;  %v728_v9 = vadd.f32 %v1369_v36, %v1367_v63  ;;  %1390 = vpow2.f32 %v828_v19 }
 0x12b   :  { %v1373_v5 = vpop.eup %1372  ;;  %1392 = vpow2.f32 %v831_v23  ;;  %v599_v26 = vmul.f32 %v1705_v28, %v1795_v47  ;;  %v765_v48 = vstv %s1869_s12  ;;  %v582_v19 = vmul.f32 1.442695, %v581_v14 }
 0x12c   :  { %v1375_v17 = vpop.eup %1374  ;;  %v713_v43 = vadd.f32 %v712_v41, %v695_v25  ;;  %v730_v27 = vmul.f32 %v729_v6, %v728_v9  ;;  %v746_v11 = vadd.f32 %v1373_v5, %v1371_v18  ;;  %1394 = vpow2.f32 %v846_v8 }
 0x12d   :  { %v1377_v46 = vpop.eup %1376  ;;  %1396 = vpow2.f32 %v849_v12  ;;  %v617_v15 = vmul.f32 %v1707_v29, %v1795_v47  ;;  %v2141_v28 = vstv %s1735_s24  ;;  %v783_v60 = vstv %s1877_s25 }
 0x12e   :  { %v1379_v21 = vpop.eup %1378  ;;  %v731_v23 = vadd.f32 %v730_v27, %v713_v43  ;;  %v748_v59 = vmul.f32 %v2141_v28, %v746_v11  ;;  %v764_v40 = vadd.f32 %v1377_v46, %v1375_v17  ;;  %1398 = vpow2.f32 %v528_v51 }
 0x12f   :  { %v1381_v35 = vpop.eup %1380  ;;  %1400 = vpow2.f32 %v546_v10  ;;  %v600_v7 = vmul.f32 1.442695, %v599_v26  ;;  %v635_v20 = vmul.f32 %v1709_v30, %v1795_v47  ;;  %v801_v63 = vstv %s1883_s26 }
 0x130   :  { %v1383_v42 = vpop.eup %1382  ;;  %v749_v29 = vadd.f32 %v748_v59, %v731_v23  ;;  %v766_v8 = vmul.f32 %v765_v48, %v764_v40  ;;  %v782_v12 = vadd.f32 %v1381_v35, %v1379_v21  ;;  %1402 = vpow2.f32 %v564_v13 }
 0x131   :  { %v1385_v3 = vpop.eup %1384  ;;  %1404 = vpow2.f32 %v582_v19  ;;  %v618_v22 = vmul.f32 1.442695, %v617_v15  ;;  %v653_v24 = vmul.f32 %v1717_v32, %v1795_v47  ;;  %v819_v14 = vstv %s1891_s27 }
 0x132   :  { %v1387_v4 = vpop.eup %1386  ;;  %v767_v36 = vadd.f32 %v766_v8, %v749_v29  ;;  %v784_v30 = vmul.f32 %v783_v60, %v782_v12  ;;  %v800_v51 = vadd.f32 %v1385_v3, %v1383_v42  ;;  %1406 = vpow2.f32 %v600_v7 }
 0x133   :  { %v1389_v16 = vpop.eup %1388  ;;  %v636_v18 = vmul.f32 1.442695, %v635_v20  ;;  %v671_v25 = vmul.f32 %v1720_v33, %v1795_v47  ;;  %v837_v13 = vstv %s1898_s28  ;;  %1408 = vpow2.f32 %v618_v22 }
 0x134   :  { %v1391_v41 = vpop.eup %1390  ;;  %v785_v9 = vadd.f32 %v784_v30, %v767_v36  ;;  %v802_v5 = vmul.f32 %v801_v63, %v800_v51  ;;  %v818_v10 = vadd.f32 %v1389_v16, %v1387_v4  ;;  %v654_v26 = vmul.f32 1.442695, %v653_v24 }
 0x135   :  { %v1393_v32 = vpop.eup %1392  ;;  %v689_v17 = vmul.f32 %v1723_v34, %v1795_v47  ;;  %v855_v19 = vstv %s1905_s29  ;;  %1410 = vpow2.f32 %v636_v18  ;;  %v672_v15 = vmul.f32 1.442695, %v671_v25 }
 0x136   :  { %v1395_v43 = vpop.eup %1394  ;;  %v803_v27 = vadd.f32 %v802_v5, %v785_v9  ;;  %v820_v11 = vmul.f32 %v819_v14, %v818_v10  ;;  %v836_v46 = vadd.f32 %v1393_v32, %v1391_v41  ;;  %v707_v21 = vmul.f32 %v1730_v38, %v1795_v47 }
 0x137   :  { %v1397_v33 = vpop.eup %1396  ;;  %1412 = vpow2.f32 %v654_v26  ;;  %v690_v7 = vmul.f32 1.442695, %v689_v17  ;;  %v725_v20 = vmul.f32 %v1733_v39, %v1795_v47  ;;  %v2142_v12 = vstv %s1661_s3 }
 0x138   :  { %v1399_v23 = vpop.eup %1398  ;;  %v821_v28 = vadd.f32 %v820_v11, %v803_v27  ;;  %v838_v59 = vmul.f32 %v837_v13, %v836_v46  ;;  %v854_v40 = vadd.f32 %v1397_v33, %v1395_v43  ;;  %1414 = vpow2.f32 %v672_v15 }
 0x139   :  { %v1401_v34 = vpop.eup %1400  ;;  %v534_v35 = vmul.f32 %v1399_v23, %v531_v31  ;;  %v708_v22 = vmul.f32 1.442695, %v707_v21  ;;  %v743_v24 = vmul.f32 %v1740_v45, %v1795_v47  ;;  %1416 = vpow2.f32 %v690_v7 }
 0x13a   :  { %v1403_v42 = vpop.eup %1402  ;;  %v839_v29 = vadd.f32 %v838_v59, %v821_v28  ;;  %v856_v8 = vmul.f32 %v855_v19, %v854_v40  ;;  %v552_v38 = vmul.f32 %v1401_v34, %v2142_v12  ;;  %v726_v30 = vmul.f32 1.442695, %v725_v20 }
 0x13b   :  { %v1405_v3 = vpop.eup %1404  ;;  %v570_v36 = vmul.f32 %v1403_v42, %v567_v37  ;;  %v761_v51 = vmul.f32 %v1744_v50, %v1795_v47  ;;  %1418 = vpow2.f32 %v708_v22  ;;  %v744_v45 = vmul.f32 1.442695, %v743_v24 }
 0x13c   :  { %v857_v31 = vadd.f32 %v856_v8, %v839_v29  ;;  %v553_v4 = vadd.f32 %v552_v38, %v534_v35  ;;  %v1407_v39 = vpop.eup %1406  ;;  %v588_v25 = vmul.f32 %v1405_v3, %v585_v44  ;;  %v779_v37 = vmul.f32 %v1748_v53, %v1795_v47 }
 0x13d   :  { %v1409_v41 = vpop.eup %1408  ;;  %v606_v5 = vmul.f32 %v1407_v39, %v603_v49  ;;  %1420 = vpow2.f32 %v726_v30  ;;  %v762_v50 = vmul.f32 1.442695, %v761_v51  ;;  %v797_v32 = vmul.f32 %v1751_v54, %v1795_v47 }
 0x13e   :  { %v861_v16 = vsel %vm860_vm2, %v857_v31, 0.0  ;;  %v571_v18 = vadd.f32 %v570_v36, %v553_v4  ;;  %v624_v44 = vmul.f32 %v1409_v41, %v621_v52  ;;  %1422 = vpow2.f32 %v744_v45 }
 0x13f   :  { %862 = vadd.xlane.f32.xlu1 %v861_v16  ;;  %v1411_v10 = vpop.eup %1410  ;;  %v780_v43 = vmul.f32 1.442695, %v779_v37  ;;  %v815_v53 = vmul.f32 %v1756_v58, %v1795_v47  ;;  %1424 = vpow2.f32 %v762_v50  ;;  %v798_v46 = vmul.f32 1.442695, %v797_v32 }
 0x140   :  { %v589_v9 = vadd.f32 %v588_v25, %v571_v18  ;;  %v642_v49 = vmul.f32 %v1411_v10, %v639_v56  ;;  %v833_v54 = vmul.f32 %v1763_v62, %v1795_v47  ;;  %v851_v58 = vmul.f32 %v1770_v2, %v1795_v47 }
 0x141   :  { %v1413_v17 = vpop.eup %1412  ;;  %1426 = vpow2.f32 %v780_v43  ;;  %v816_v21 = vmul.f32 1.442695, %v815_v53  ;;  %v2143_v29 = vstv %s1735_s24 }
 0x142   :  { %v607_v26 = vadd.f32 %v606_v5, %v589_v9  ;;  %v1415_v11 = vpop.eup %1414  ;;  %v660_v52 = vmul.f32 %v1413_v17, %v657_v57  ;;  %1428 = vpow2.f32 %v798_v46  ;;  %v834_v59 = vmul.f32 1.442695, %v833_v54 }
 0x143   :  { %v1417_v15 = vpop.eup %1416  ;;  %v678_v56 = vmul.f32 %v1415_v11, %v675_v61  ;;  %1430 = vpow2.f32 %v816_v21  ;;  %v852_v34 = vmul.f32 1.442695, %v851_v58 }
 0x144   :  { %v625_v27 = vadd.f32 %v624_v44, %v607_v26  ;;  %v696_v62 = vmul.f32 %v1417_v15, %v693_v0  ;;  %1432 = vpow2.f32 %v834_v59 }
 0x145   :  { %v1419_v28 = vpop.eup %1418  ;;  %1434 = vpow2.f32 %v852_v34 }
 0x146   :  { %v643_v33 = vadd.f32 %v642_v49, %v625_v27  ;;  %v714_v7 = vmul.f32 %v1419_v28, %v711_v1 }
 0x147   :  { %v1421_v57 = vpop.eup %1420 }
 0x148   :  { %v661_v23 = vadd.f32 %v660_v52, %v643_v33  ;;  %v1423_v2 = vpop.eup %1422  ;;  %v732_v61 = vmul.f32 %v1421_v57, %v729_v6 }
 0x149   :  { %v1425_v20 = vpop.eup %1424  ;;  %v750_v0 = vmul.f32 %v1423_v2, %v2143_v29 }
 0x14a   :  { %v679_v40 = vadd.f32 %v678_v56, %v661_v23  ;;  %v768_v38 = vmul.f32 %v1425_v20, %v765_v48 }
 0x14b   :  { %v1427_v8 = vpop.eup %1426 }
 0x14c   :  { %v697_v35 = vadd.f32 %v696_v62, %v679_v40  ;;  %v1429_v3 = vpop.eup %1428  ;;  %v786_v22 = vmul.f32 %v1427_v8, %v783_v60 }
 0x14d   :  { %v1431_v24 = vpop.eup %1430  ;;  %v804_v6 = vmul.f32 %v1429_v3, %v801_v63 }
 0x14e   :  { %v715_v47 = vadd.f32 %v714_v7, %v697_v35  ;;  %v1433_v4 = vpop.eup %1432  ;;  %v822_v39 = vmul.f32 %v1431_v24, %v819_v14 }
 0x14f   :  { %v1435_v30 = vpop.eup %1434  ;;  %v840_v16 = vmul.f32 %v1433_v4, %v837_v13 }
 0x150   :  { %v733_v42 = vadd.f32 %v732_v61, %v715_v47  ;;  %v858_v25 = vmul.f32 %v1435_v30, %v855_v19 }
 0x152   :  { %v751_v12 = vadd.f32 %v750_v0, %v733_v42 }
 0x154   :  { %v769_v1 = vadd.f32 %v768_v38, %v751_v12 }
 0x156   :  { %v787_v31 = vadd.f32 %v786_v22, %v769_v1 }
 0x158   :  { %v805_v36 = vadd.f32 %v804_v6, %v787_v31 }
 0x15a   :  { %v823_v51 = vadd.f32 %v822_v39, %v805_v36 }
 0x15c   :  { %v841_v18 = vadd.f32 %v840_v16, %v823_v51 }
 0x15e   :  { %v859_v48 = vadd.f32 %v858_v25, %v841_v18 }
 0x160   :  { %v871_v41 = vsel %vm860_vm2, %v859_v48, 0.0 }
 0x161   :  { %872 = vadd.xlane.f32.xlu1 %v871_v41 }
 0x1cc   :  { %v863_v60 = vpop.xlane.xlu1 %862 }
 0x1cd   :  { %v864_v45 = vrot.slane %v863_v60, 4 }
 0x1cf   :  { %v865_v37 = vadd.f32 %v864_v45, %v863_v60 }
 0x1d1   :  { %v866_v9 = vrot.slane %v865_v37, 2 }
 0x1d3   :  { %v867_v63 = vadd.f32 %v866_v9, %v865_v37 }
 0x1d5   :  { %v868_v5 = vrot.slane %v867_v63, 1 }
 0x1d7   :  { %v869_v10 = vadd.f32 %v868_v5, %v867_v63 }
 0x1d9   :  { %1308 = vpush %v869_v10 }
 0x1ee   :  { %v873_v14 = vpop.xlane.xlu1 %872 }
 0x1ef   :  { %v874_v50 = vrot.slane %v873_v14, 4 }
 0x1f1   :  { %v875_v32 = vadd.f32 %v874_v50, %v873_v14 }
 0x1f3   :  { %v876_v26 = vrot.slane %v875_v32, 2 }
 0x1f5   :  { %v877_v13 = vadd.f32 %v876_v26, %v875_v32 }
 0x1f7   :  { %v878_v44 = vrot.slane %v877_v13, 1 }
 0x1f9   :  { %v879_v17 = vadd.f32 %v878_v44, %v877_v13 }
 0x1fb   :  { %1310 = vpush %v879_v17 }
 0x20a   :  { %s1989_s10 = spop %1308 }
 0x226   :  { %883 = sbr.rel (%p1182_p12) target bundleno = 563 (0x233), region = 37 }
 0x22c   :  { %s1991_s2 = spop %1310 }
 0x22d   :  { %s884_s17 = smul.f32 2.0, %s1991_s2 }
 0x22f   :  { %s885_s30 = ssub.f32 %s1989_s10, %s884_s17 }
 0x231   :  { %v886_v19 = vstv %s885_s30 }
 0x232   :  { %887 = vst [vmem:[#allocation7] sm:$0xff] %v886_v19 }
 0x233 PF:  { %p1183_p13 = scmp.eq.s32.totalorder %s2125_s0, %s2126_s1 }
 0x234   :  { %s892_s18 = sld [smem:[#allocation5]] (!%p1183_p13)  ;;  %s1184_s19 = sld [smem:[#allocation5 + $0x1]] (!%p1183_p13) }
 0x235   :  { %891 = sbr.rel (%p1183_p13) target bundleno = 836 (0x344), region = 41  ;;  %s1186_s4 = sld [smem:[#allocation5 + $0x2]] (!%p1183_p13) }
 0x236   :  { %s1188_s5 = sld [smem:[#allocation5 + $0x3]] (!%p1183_p13)  ;;  %s1190_s8 = sld [smem:[#allocation5 + $0x4]] (!%p1183_p13) }
 0x237   :  { %s1192_s9 = sld [smem:[#allocation5 + $0x5]] (!%p1183_p13)  ;;  %s2007_s20 = sld [smem:[#allocation5 + $0x6]] (!%p1183_p13) }
 0x238   :  { %s2010_s21 = sld [smem:[#allocation5 + $0x7]] (!%p1183_p13)  ;;  %s2013_s22 = sld [smem:[#allocation5 + $0x8]] (!%p1183_p13) }
 0x239   :  { %s2016_s0 = sld [smem:[#allocation5 + $0x9]] (!%p1183_p13)  ;;  %s2018_s1 = sld [smem:[#allocation6]] (!%p1183_p13) }
 0x23a   :  { %v894_v43 = vstv (!%p1183_p13), %s892_s18  ;;  %v903_v27 = vstv (!%p1183_p13), %s1184_s19  ;;  %s2021_s23 = sld [smem:[#allocation5 + $0xa]] (!%p1183_p13)  ;;  %s2023_s24 = sld [smem:[#allocation6 + $0x1]] (!%p1183_p13) }
 0x23b   :  { %v895_v53 = vmul.f32 (!%p1183_p13), %v894_v43, %v1799_v55  ;;  %v904_v49 = vmul.f32 (!%p1183_p13), %v903_v27, %v1799_v55  ;;  %v912_v11 = vstv (!%p1183_p13), %s1186_s4  ;;  %s2026_s12 = sld [smem:[#allocation5 + $0xb]] (!%p1183_p13)  ;;  %s2028_s25 = sld [smem:[#allocation6 + $0x2]] (!%p1183_p13) }
 0x23c   :  { %v913_v54 = vmul.f32 %v912_v11, %v1799_v55  ;;  %v921_v33 = vstv %s1188_s5  ;;  %v930_v21 = vstv %s1190_s8  ;;  %s2030_s26 = sld [smem:[#allocation6 + $0x3]]  ;;  %s2034_s27 = sld [smem:[#allocation5 + $0xc]] }
 0x23d   :  { %v896_v46 = vmul.f32 1.442695, %v895_v53  ;;  %v905_v52 = vmul.f32 1.442695, %v904_v49  ;;  %v922_v15 = vmul.f32 %v921_v33, %v1799_v55  ;;  %v931_v23 = vmul.f32 %v930_v21, %v1799_v55  ;;  %s2036_s28 = sld [smem:[#allocation5 + $0xd]]  ;;  %s2040_s29 = sld [smem:[#allocation6 + $0x4]] }
 0x23e   :  { %v914_v58 = vmul.f32 1.442695, %v913_v54  ;;  %v939_v56 = vstv %s1192_s9  ;;  %v948_v62 = vstv %s2007_s20  ;;  %v957_v35 = vstv %s2010_s21  ;;  %s2044_s3 = sld [smem:[#allocation5 + $0xe]]  ;;  %s2047_s6 = sld [smem:[#allocation6 + $0x5]] }
 0x23f   :  { %1436 = vpow2.f32 %v896_v46  ;;  %v923_v28 = vmul.f32 1.442695, %v922_v15  ;;  %v940_v59 = vmul.f32 %v939_v56, %v1799_v55  ;;  %v932_v40 = vmul.f32 1.442695, %v931_v23  ;;  %s2053_s7 = sld [smem:[#allocation5 + $0xf]]  ;;  %s2056_s11 = sld [smem:[#allocation6 + $0x6]] }
 0x240   :  { %1438 = vpow2.f32 %v905_v52  ;;  %v949_v34 = vmul.f32 %v948_v62, %v1799_v55  ;;  %v958_v7 = vmul.f32 %v957_v35, %v1799_v55  ;;  %v966_v2 = vstv %s2013_s22  ;;  %s2061_s17 = sld [smem:[#allocation5 + $0x10]]  ;;  %s2065_s30 = sld [smem:[#allocation6 + $0x7]] }
 0x241   :  { %1440 = vpow2.f32 %v914_v58  ;;  %v941_v57 = vmul.f32 1.442695, %v940_v59  ;;  %v967_v61 = vmul.f32 %v966_v2, %v1799_v55  ;;  %v975_v42 = vstv %s2016_s0  ;;  %s2070_s13 = sld [smem:[#allocation5 + $0x11]]  ;;  %s2074_s14 = sld [smem:[#allocation5 + $0x12]] }
 0x242   :  { %1442 = vpow2.f32 %v923_v28  ;;  %v950_v47 = vmul.f32 1.442695, %v949_v34  ;;  %v959_v20 = vmul.f32 1.442695, %v958_v7  ;;  %v984_v29 = vstv %s2021_s23  ;;  %s2076_s15 = sld [smem:[#allocation6 + $0x8]]  ;;  %s2080_s16 = sld [smem:[#allocation6 + $0x9]] }
 0x243   :  { %1444 = vpow2.f32 %v932_v40  ;;  %v968_v0 = vmul.f32 1.442695, %v967_v61  ;;  %v976_v8 = vmul.f32 %v975_v42, %v1799_v55  ;;  %v985_v12 = vmul.f32 %v984_v29, %v1799_v55  ;;  %s2085_s18 = sld [smem:[#allocation6 + $0xa]]  ;;  %s2090_s19 = sld [smem:[#allocation6 + $0xb]] }
 0x244   :  { %1446 = vpow2.f32 %v941_v57  ;;  %v898_v38 = vstv %s2018_s1  ;;  %v993_v3 = vstv %s2026_s12  ;;  %v907_v1 = vstv %s2023_s24  ;;  %s2096_s4 = sld [smem:[#allocation6 + $0xc]]  ;;  %s2100_s5 = sld [smem:[#allocation6 + $0xd]] }
 0x245   :  { %1448 = vpow2.f32 %v950_v47  ;;  %v977_v22 = vmul.f32 1.442695, %v976_v8  ;;  %v994_v24 = vmul.f32 %v993_v3, %v1799_v55  ;;  %v916_v6 = vstv %s2028_s25  ;;  %s2104_s8 = sld [smem:[#allocation6 + $0xe]]  ;;  %s1213_s9 = sld [smem:[#allocation6 + $0xf]] }
 0x246   :  { %1450 = vpow2.f32 %v959_v20  ;;  %v925_v4 = vstv %s2030_s26  ;;  %v1002_v36 = vstv %s2034_s27  ;;  %v1011_v39 = vstv %s2036_s28  ;;  %s1215_s20 = sld [smem:[#allocation6 + $0x10]]  ;;  %s1217_s21 = sld [smem:[#allocation6 + $0x11]] }
 0x247   :  { %1452 = vpow2.f32 %v968_v0  ;;  %v986_v16 = vmul.f32 1.442695, %v985_v12  ;;  %v1003_v18 = vmul.f32 %v1002_v36, %v1799_v55  ;;  %v934_v41 = vstv %s2040_s29  ;;  %s1219_s22 = sld [smem:[#allocation6 + $0x12]]  ;;  %s1073_s0 = ssub.f32 %s1989_s10, %s1991_s2 }
 0x248   :  { %v1020_v60 = vstv %s2044_s3  ;;  %1454 = vpow2.f32 %v977_v22  ;;  %v995_v9 = vmul.f32 1.442695, %v994_v24  ;;  %v1012_v63 = vmul.f32 %v1011_v39, %v1799_v55 }
 0x249   :  { %v1437_v31 = vpop.eup %1436  ;;  %v943_v50 = vstv %s2047_s6  ;;  %1456 = vpow2.f32 %v986_v16  ;;  %v1004_v26 = vmul.f32 1.442695, %v1003_v18  ;;  %v1021_v13 = vmul.f32 %v1020_v60, %v1799_v55 }
 0x24a   :  { %v1439_v30 = vpop.eup %1438  ;;  %v899_v51 = vmul.f32 %v1437_v31, %v898_v38  ;;  %v1029_v44 = vstv %s2053_s7  ;;  %v952_v43 = vstv %s2056_s11  ;;  %1458 = vpow2.f32 %v995_v9 }
 0x24b   :  { %v1441_v25 = vpop.eup %1440  ;;  %v908_v48 = vmul.f32 %v1439_v30, %v907_v1  ;;  %v1013_v27 = vmul.f32 1.442695, %v1012_v63  ;;  %v1030_v49 = vmul.f32 %v1029_v44, %v1799_v55  ;;  %v1038_v11 = vstv %s2061_s17 }
 0x24c   :  { %v1443_v45 = vpop.eup %1442  ;;  %v917_v37 = vmul.f32 %v1441_v25, %v916_v6  ;;  %v961_v33 = vstv %s2065_s30  ;;  %1460 = vpow2.f32 %v1004_v26  ;;  %v1022_v15 = vmul.f32 1.442695, %v1021_v13 }
 0x24d   :  { %v1445_v5 = vpop.eup %1444  ;;  %v909_v10 = vadd.f32 %v908_v48, %v899_v51  ;;  %v926_v14 = vmul.f32 %v1443_v45, %v925_v4  ;;  %v1039_v21 = vmul.f32 %v1038_v11, %v1799_v55  ;;  %v1047_v58 = vstv %s2070_s13 }
 0x24e   :  { %v1447_v32 = vpop.eup %1446  ;;  %v935_v19 = vmul.f32 %v1445_v5, %v934_v41  ;;  %v1056_v28 = vstv %s2074_s14  ;;  %v970_v40 = vstv %s2076_s15  ;;  %1462 = vpow2.f32 %v1013_v27 }
 0x24f   :  { %v918_v17 = vadd.f32 %v917_v37, %v909_v10  ;;  %v1449_v53 = vpop.eup %1448  ;;  %v944_v54 = vmul.f32 %v1447_v32, %v943_v50  ;;  %v1031_v62 = vmul.f32 1.442695, %v1030_v49  ;;  %v1048_v57 = vmul.f32 %v1047_v58, %v1799_v55 }
 0x250   :  { %v1451_v52 = vpop.eup %1450  ;;  %v953_v56 = vmul.f32 %v1449_v53, %v952_v43  ;;  %v979_v2 = vstv %s2080_s16  ;;  %1464 = vpow2.f32 %v1022_v15  ;;  %v1040_v47 = vmul.f32 1.442695, %v1039_v21 }
 0x251   :  { %v927_v46 = vadd.f32 %v926_v14, %v918_v17  ;;  %v1453_v59 = vpop.eup %1452  ;;  %v962_v35 = vmul.f32 %v1451_v52, %v961_v33  ;;  %v1057_v61 = vmul.f32 %v1056_v28, %v1799_v55  ;;  %v988_v0 = vstv %s2085_s18 }
 0x252   :  { %v1455_v7 = vpop.eup %1454  ;;  %v971_v42 = vmul.f32 %v1453_v59, %v970_v40  ;;  %1466 = vpow2.f32 %v1031_v62  ;;  %v1049_v8 = vmul.f32 1.442695, %v1048_v57  ;;  %v997_v1 = vstv %s2090_s19 }
 0x253   :  { %v936_v23 = vadd.f32 %v935_v19, %v927_v46  ;;  %v1457_v29 = vpop.eup %1456  ;;  %v980_v38 = vmul.f32 %v1455_v7, %v979_v2  ;;  %1468 = vpow2.f32 %v1040_v47  ;;  %v1058_v22 = vmul.f32 1.442695, %v1057_v61 }
 0x254   :  { %v1459_v3 = vpop.eup %1458  ;;  %v989_v55 = vmul.f32 %v1457_v29, %v988_v0  ;;  %v1006_v6 = vstv %s2096_s4  ;;  %1470 = vpow2.f32 %v1049_v8  ;;  %v1015_v30 = vstv %s2100_s5 }
 0x255   :  { %v945_v34 = vadd.f32 %v944_v54, %v936_v23  ;;  %v998_v36 = vmul.f32 %v1459_v3, %v997_v1  ;;  %1472 = vpow2.f32 %v1058_v22  ;;  %v1024_v25 = vstv %s2104_s8 }
 0x256   :  { %v1461_v31 = vpop.eup %1460  ;;  %v1033_v45 = vstv %s1213_s9  ;;  %v1042_v5 = vstv %s1215_s20  ;;  %v1051_v32 = vstv %s1217_s21  ;;  %v1060_v17 = vstv %s1219_s22 }
 0x257   :  { %v954_v20 = vadd.f32 %v953_v56, %v945_v34  ;;  %v1007_v16 = vmul.f32 %v1461_v31, %v1006_v6 }
 0x258   :  { %v1463_v39 = vpop.eup %1462 }
 0x259   :  { %v963_v12 = vadd.f32 %v962_v35, %v954_v20  ;;  %v1016_v41 = vmul.f32 %v1463_v39, %v1015_v30 }
 0x25a   :  { %v1465_v18 = vpop.eup %1464 }
 0x25b   :  { %v972_v24 = vadd.f32 %v971_v42, %v963_v12  ;;  %v1025_v9 = vmul.f32 %v1465_v18, %v1024_v25 }
 0x25c   :  { %v1467_v60 = vpop.eup %1466 }
 0x25d   :  { %v981_v4 = vadd.f32 %v980_v38, %v972_v24  ;;  %v1469_v63 = vpop.eup %1468  ;;  %v1034_v14 = vmul.f32 %v1467_v60, %v1033_v45 }
 0x25e   :  { %v1471_v50 = vpop.eup %1470  ;;  %v1043_v13 = vmul.f32 %v1469_v63, %v1042_v5 }
 0x25f   :  { %v990_v51 = vadd.f32 %v989_v55, %v981_v4  ;;  %v1473_v44 = vpop.eup %1472  ;;  %v1052_v43 = vmul.f32 %v1471_v50, %v1051_v32 }
 0x260   :  { %v1061_v27 = vmul.f32 %v1473_v44, %v1060_v17 }
 0x261   :  { %v999_v48 = vadd.f32 %v998_v36, %v990_v51 }
 0x263   :  { %v1008_v37 = vadd.f32 %v1007_v16, %v999_v48 }
 0x265   :  { %v1017_v10 = vadd.f32 %v1016_v41, %v1008_v37 }
 0x267   :  { %v1026_v26 = vadd.f32 %v1025_v9, %v1017_v10 }
 0x269   :  { %v1035_v19 = vadd.f32 %v1034_v14, %v1026_v26 }
 0x26b   :  { %v1044_v53 = vadd.f32 %v1043_v13, %v1035_v19 }
 0x26d   :  { %v1053_v49 = vadd.f32 %v1052_v43, %v1044_v53 }
 0x26f   :  { %v1062_v11 = vadd.f32 %v1061_v27, %v1053_v49 }
 0x271   :  { %v1063_v46 = vsel %vm860_vm2, %v1062_v11, 0.0 }
 0x272   :  { %1064 = vadd.xlane.f32.xlu0 %v1063_v46 }
 0x2ff   :  { %v1065_v54 = vpop.xlane.xlu0 %1064 }
 0x300   :  { %v1066_v33 = vrot.slane %v1065_v54, 4 }
 0x302   :  { %v1067_v52 = vadd.f32 %v1066_v33, %v1065_v54 }
 0x304   :  { %v1068_v15 = vrot.slane %v1067_v52, 2 }
 0x306   :  { %v1069_v21 = vadd.f32 %v1068_v15, %v1067_v52 }
 0x308   :  { %v1070_v58 = vrot.slane %v1069_v21, 1 }
 0x30a   :  { %v1071_v23 = vadd.f32 %v1070_v58, %v1069_v21 }
 0x30c   :  { %1312 = vpush %v1071_v23 }
 0x33d   :  { %s1313_s1 = spop %1312 }
 0x33e   :  { %s1074_s23 = ssub.f32 %s1073_s0, %s1313_s1 }
 0x340   :  { %s1075_s24 = smul.f32 2.0, %s1074_s23 }
 0x342   :  { %v1076_v56 = vstv %s1075_s24 }
 0x343   :  { %1077 = vst [vmem:[#allocation7] sm:$0xff] %v1076_v56 }
 0x344 PF:  { %s1530_s12 = smov [#allocation7]  }
 0x345   :  { %s1084_s25 = sshll.u32 %s1530_s12, 4  ;;  %s1085_s25 = int_to_ptr.vmem [resolvable:$true] %s1084_s25 }
 0x346   :  { %s1498_s26 = scalar_lea.vmem %s1085_s25, 128  ;;  %p1503_p1 = scmp.lt.s32.totalorder %s1085_s25, %s1085_s25 }
 0x347   :  { %p1499_p0 = scmp.ne.s32.totalorder %s1085_s25, %s1498_s26  ;;  %p1504_p2 = scmp.lt.s32.totalorder %s1498_s26, %s1498_s26 }
 0x349   :  { %p1505_p3 = por %p1504_p2, %p1503_p1 }
 0x34b   :  { %p1506_p4 = pnand %p1505_p3, %p1499_p0 }
 0x34d   :  { %1509 = shalt.err (!%p1506_p4)
}
 0x34e   :  { %s2144_s29 = sld [smem:[#allocation11_spill]] }
 0x354   :  { %s1510_s10 = scalar_lea.hbm %s2144_s29, 128 }
 0x355   :  { %p1511_p5 = scmp.ne.s32.totalorder %s2144_s29, %s1510_s10  ;;  %p1514_p6 = scmp.lt.u32.totalorder %s1510_s10, %s2144_s29 }
 0x357   :  { %p1516_p7 = pnand %p1514_p6, %p1511_p5 }
 0x359   :  { %1519 = shalt.err (!%p1516_p7)
}
 0x35a   :  { %1087 = dma.vmem_to_hbm [thread:$0]  %s1085_s25, 128, %s2144_s29, [#allocation8]  }
 0x35b   :  { %1522 = dma.done.wait [#allocation8], 128  }
 0x35c   :  { %1523 = vsyncadd [#allocation8], 4294967168 }
 0x35d   :  { %1091 = vsyncpa [#allocation8], 1 }

</bundles_post_ra>
